<compile_context>
chip_gen: v6e
topology: v6e:2x2x1
jax: 0.10.0
libtpu: 0.0.40
codegen_flags: <defaults>
</compile_context>

<pallas_src>
import functools

import jax
import jax.numpy as jnp
import numpy as np
from jax.experimental import pallas as pl
from jax.experimental.pallas import tpu as pltpu


# --------------------------------------------------------------------------
# Fused Pallas kernel: all LSTM layers + final FC in one call
# --------------------------------------------------------------------------
def _lstm_forecast_kernel(*refs, seq_len, batch, hidden, num_layers):
    """Flat ref layout (inputs..., outputs..., scratch...):

      refs[0]                       : x2d      (S*B, D_in)   time-major, row = t*B + b
      refs[1 + 3l + 0]              : W_ih^T   (D_l, 4H)
      refs[1 + 3l + 1]              : W_hh^T   (H,   4H)
      refs[1 + 3l + 2]              : bias     (1,   4H)     (= b_ih + b_hh)
      refs[1 + 3L + 0]              : fc W^T   (H, O)
      refs[1 + 3L + 1]              : fc bias  (1, O)
      refs[1 + 3L + 2]              : out      (B, O)        [output]
      refs[1 + 3L + 3]              : seq_scr  (S*B, H)      [VMEM scratch]

    Gate order matches PyTorch: i, f, g, o.
    """
    S, B, H = seq_len, batch, hidden

    x_ref = refs[0]
    w_refs = refs[1:1 + 3 * num_layers]
    fcw_ref = refs[1 + 3 * num_layers]
    fcb_ref = refs[2 + 3 * num_layers]
    out_ref = refs[3 + 3 * num_layers]
    seq_scr = refs[4 + 3 * num_layers]

    cur_in = x_ref[...]                                  # (S*B, D_in), VMEM resident
    h = jnp.zeros((B, H), jnp.float32)
    c = jnp.zeros((B, H), jnp.float32)

    for layer in range(num_layers):                      # num_layers is small & static
        wih = w_refs[3 * layer][...]                     # (D_l, 4H)
        whh = w_refs[3 * layer + 1][...]                 # (H,   4H)
        b = w_refs[3 * layer + 2][...]                   # (1,   4H)

        # Hoisted input projection: one well-shaped GEMM for all timesteps,
        # bias folded in once (not per step).
        px = jnp.dot(cur_in, wih, preferred_element_type=jnp.float32) + b   # (S*B, 4H)

        h = jnp.zeros((B, H), jnp.float32)
        c = jnp.zeros((B, H), jnp.float32)
        last_layer = (layer == num_layers - 1)

        # Serial recurrence, fully unrolled (static S): only the recurrent
        # (B,H)x(H,4H) matmul is on the critical path per step.
        for t in range(S):
            gates = px[t * B:(t + 1) * B, :] + jnp.dot(
                h, whh, preferred_element_type=jnp.float32)          # (B, 4H)

            # Nonlinearities on the full 4H-wide register, then static slices.
            sig = jax.nn.sigmoid(gates)
            th = jnp.tanh(gates)
            i_g = sig[:, 0 * H:1 * H]
            f_g = sig[:, 1 * H:2 * H]
            g_g = th[:, 2 * H:3 * H]
            o_g = sig[:, 3 * H:4 * H]

            c = f_g * c + i_g * g_g
            h = o_g * jnp.tanh(c)

            if not last_layer:
                # Hidden sequence stays in VMEM scratch; it feeds the next
                # layer's hoisted input GEMM. Never written to HBM.
                seq_scr[t * B:(t + 1) * B, :] = h

        if not last_layer:
            cur_in = seq_scr[...]                        # (S*B, H)

    # h == h_n[-1] of the top layer. Fused final Linear.
    out_ref[...] = (
        jnp.dot(h, fcw_ref[...], preferred_element_type=jnp.float32)
        + fcb_ref[...]
    )


# --------------------------------------------------------------------------
# Wrapper
# --------------------------------------------------------------------------
def lstm_forecast_pallas(x, layer_params, fc_w_t, fc_b_row, hidden_size):
    """x: (B, S, input_size) batch_first float32, like the PyTorch module."""
    B, S, _ = x.shape
    H = hidden_size
    O = fc_w_t.shape[1]
    num_layers = len(layer_params)

    # Time-major, flattened: row index = t*B + b.
    x2d = jnp.transpose(x, (1, 0, 2)).reshape(S * B, -1)

    flat_params = []
    for (wih_t, whh_t, b) in layer_params:
        flat_params += [wih_t, whh_t, b]

    kernel = functools.partial(
        _lstm_forecast_kernel,
        seq_len=S, batch=B, hidden=H, num_layers=num_layers)

    return pl.pallas_call(
        kernel,
        out_shape=jax.ShapeDtypeStruct((B, O), jnp.float32),
        # No grid: single invocation, all operands are whole-array VMEM blocks.
        scratch_shapes=[pltpu.VMEM((S * B, H), jnp.float32)],   # inter-layer h sequence
    )(x2d, *flat_params, fc_w_t, fc_b_row)


# --------------------------------------------------------------------------
# Pure-JAX reference (mirrors torch.nn.LSTM + Linear semantics)
# --------------------------------------------------------------------------
def lstm_forecast_ref(x, layer_params, fc_w_t, fc_b_row, hidden_size):
    B = x.shape[0]
    H = hidden_size
    seq = jnp.transpose(x, (1, 0, 2))
    for (wih_t, whh_t, b) in layer_params:
        def step(carry, x_t):
            h, c = carry
            gates = x_t @ wih_t + h @ whh_t + b
            i_g, f_g, g_g, o_g = jnp.split(gates, 4, axis=-1)
            i_g = jax.nn.sigmoid(i_g)
            f_g = jax.nn.sigmoid(f_g)
            g_g = jnp.tanh(g_g)
            o_g = jax.nn.sigmoid(o_g)
            c = f_g * c + i_g * g_g
            h = o_g * jnp.tanh(c)
            return (h, c), h
        init = (jnp.zeros((B, H), jnp.float32), jnp.zeros((B, H), jnp.float32))
        _, seq = jax.lax.scan(step, init, seq)
    return seq[-1] @ fc_w_t + fc_b_row


# --------------------------------------------------------------------------
# Main
# --------------------------------------------------------------------------
if __name__ == "__main__":
    B, S = 2, 8                    # batch, sequence length
    INPUT, HIDDEN, LAYERS, OUT = 8, 32, 2, 4

    key = jax.random.PRNGKey(0)
    k_x, key = jax.random.split(key)
    x = jax.random.normal(k_x, (B, S, INPUT), dtype=jnp.float32)

    # Deterministic parameter init (PyTorch-style U(-1/sqrt(H), 1/sqrt(H))).
    bound = 1.0 / np.sqrt(HIDDEN)
    layer_params = []
    for layer in range(LAYERS):
        d_in = INPUT if layer == 0 else HIDDEN
        k1, k2, k3, k4, key = jax.random.split(key, 5)
        wih_t = jax.random.uniform(k1, (d_in, 4 * HIDDEN), jnp.float32, -bound, bound)
        whh_t = jax.random.uniform(k2, (HIDDEN, 4 * HIDDEN), jnp.float32, -bound, bound)
        b_ih = jax.random.uniform(k3, (1, 4 * HIDDEN), jnp.float32, -bound, bound)
        b_hh = jax.random.uniform(k4, (1, 4 * HIDDEN), jnp.float32, -bound, bound)
        layer_params.append((wih_t, whh_t, b_ih + b_hh))   # PyTorch adds both biases

    k5, k6, key = jax.random.split(key, 3)
    fc_bound = 1.0 / np.sqrt(HIDDEN)
    fc_w_t = jax.random.uniform(k5, (HIDDEN, OUT), jnp.float32, -fc_bound, fc_bound)
    fc_b_row = jax.random.uniform(k6, (1, OUT), jnp.float32, -fc_bound, fc_bound)

    out = lstm_forecast_pallas(x, layer_params, fc_w_t, fc_b_row, HIDDEN)
    out = jax.block_until_ready(out)
    assert out.shape == (B, OUT), out.shape

    ref = jax.block_until_ready(
        lstm_forecast_ref(x, layer_params, fc_w_t, fc_b_row, HIDDEN))
    # Default MXU precision (no Precision.HIGHEST) => allow bf16-pass-level error.
    np.testing.assert_allclose(np.asarray(out), np.asarray(ref),
                               rtol=2e-2, atol=2e-2)

    print("KERNEL_OK")
</pallas_src>

<mosaic_0001>
module attributes {stable_mosaic.version = 11 : i64} {
  func.func @_lstm_forecast_kernel(%arg0: memref<16x8xf32, #tpu.memory_space<vmem>>, %arg1: memref<8x128xf32, #tpu.memory_space<vmem>>, %arg2: memref<32x128xf32, #tpu.memory_space<vmem>>, %arg3: memref<1x128xf32, #tpu.memory_space<vmem>>, %arg4: memref<32x128xf32, #tpu.memory_space<vmem>>, %arg5: memref<32x128xf32, #tpu.memory_space<vmem>>, %arg6: memref<1x128xf32, #tpu.memory_space<vmem>>, %arg7: memref<32x4xf32, #tpu.memory_space<vmem>>, %arg8: memref<1x4xf32, #tpu.memory_space<vmem>>, %arg9: memref<2x4xf32, #tpu.memory_space<vmem>>, %arg10: memref<16x32xf32, #tpu.memory_space<vmem>>) attributes {dimension_semantics = [], scalar_prefetch = 0 : i64, scratch_operands = 1 : i64, tpu.core_type = #tpu.core_type<tc>} {
    %c0 = arith.constant 0 : index
    %c0_0 = arith.constant 0 : index
    %0 = vector.load %arg0[%c0, %c0_0] : memref<16x8xf32, #tpu.memory_space<vmem>>, vector<16x8xf32>
    %c0_1 = arith.constant 0 : index
    %c0_2 = arith.constant 0 : index
    %1 = vector.load %arg1[%c0_1, %c0_2] : memref<8x128xf32, #tpu.memory_space<vmem>>, vector<8x128xf32>
    %c0_3 = arith.constant 0 : index
    %c0_4 = arith.constant 0 : index
    %2 = vector.load %arg2[%c0_3, %c0_4] : memref<32x128xf32, #tpu.memory_space<vmem>>, vector<32x128xf32>
    %c0_5 = arith.constant 0 : index
    %c0_6 = arith.constant 0 : index
    %3 = vector.load %arg3[%c0_5, %c0_6] : memref<1x128xf32, #tpu.memory_space<vmem>>, vector<1x128xf32>
    %cst = arith.constant dense<0.000000e+00> : vector<16x128xf32>
    %4 = tpu.matmul %0, %1, %cst {dimension_numbers = #tpu.dot_dimension_numbers<[1], [0], [0], [1], [0, 0, 1, 1], [], []>} : vector<16x8xf32>, vector<8x128xf32>, vector<16x128xf32> -> vector<16x128xf32>
    %5 = vector.broadcast %3 : vector<1x128xf32> to vector<16x128xf32>
    %6 = arith.addf %4, %5 : vector<16x128xf32>
    %cst_7 = arith.constant 0.000000e+00 : f32
    %7 = vector.broadcast %cst_7 : f32 to vector<2x32xf32>
    %cst_8 = arith.constant 0.000000e+00 : f32
    %8 = vector.broadcast %cst_8 : f32 to vector<2x32xf32>
    %9 = vector.extract_strided_slice %6 {offsets = [0, 0], sizes = [2, 128], strides = [1, 1]} : vector<16x128xf32> to vector<2x128xf32>
    %cst_9 = arith.constant dense<0.000000e+00> : vector<2x128xf32>
    %10 = tpu.matmul %7, %2, %cst_9 {dimension_numbers = #tpu.dot_dimension_numbers<[1], [0], [0], [1], [0, 0, 1, 1], [], []>} : vector<2x32xf32>, vector<32x128xf32>, vector<2x128xf32> -> vector<2x128xf32>
    %11 = arith.addf %9, %10 : vector<2x128xf32>
    %12 = arith.negf %11 : vector<2x128xf32>
    %13 = math.exp %12 : vector<2x128xf32>
    %cst_10 = arith.constant 1.000000e+00 : f32
    %14 = vector.broadcast %cst_10 : f32 to vector<2x128xf32>
    %15 = arith.addf %14, %13 : vector<2x128xf32>
    %16 = arith.divf %14, %15 : vector<2x128xf32>
    %17 = math.tanh %11 : vector<2x128xf32>
    %18 = vector.extract_strided_slice %16 {offsets = [0, 0], sizes = [2, 32], strides = [1, 1]} : vector<2x128xf32> to vector<2x32xf32>
    %19 = vector.extract_strided_slice %16 {offsets = [0, 32], sizes = [2, 32], strides = [1, 1]} : vector<2x128xf32> to vector<2x32xf32>
    %20 = vector.extract_strided_slice %17 {offsets = [0, 64], sizes = [2, 32], strides = [1, 1]} : vector<2x128xf32> to vector<2x32xf32>
    %21 = vector.extract_strided_slice %16 {offsets = [0, 96], sizes = [2, 32], strides = [1, 1]} : vector<2x128xf32> to vector<2x32xf32>
    %22 = arith.mulf %19, %8 : vector<2x32xf32>
    %23 = arith.mulf %18, %20 : vector<2x32xf32>
    %24 = arith.addf %22, %23 : vector<2x32xf32>
    %25 = math.tanh %24 : vector<2x32xf32>
    %26 = arith.mulf %21, %25 : vector<2x32xf32>
    %c0_11 = arith.constant 0 : index
    %c0_12 = arith.constant 0 : index
    %27 = vector.load %arg10[%c0_11, %c0_12] : memref<16x32xf32, #tpu.memory_space<vmem>>, vector<2x32xf32>
    tpu.vector_store %arg10[%c0_11, %c0_12], %26 {strides = array<i32>} : memref<16x32xf32, #tpu.memory_space<vmem>>, vector<2x32xf32>,
    %28 = vector.extract_strided_slice %6 {offsets = [2, 0], sizes = [2, 128], strides = [1, 1]} : vector<16x128xf32> to vector<2x128xf32>
    %cst_13 = arith.constant dense<0.000000e+00> : vector<2x128xf32>
    %29 = tpu.matmul %26, %2, %cst_13 {dimension_numbers = #tpu.dot_dimension_numbers<[1], [0], [0], [1], [0, 0, 1, 1], [], []>} : vector<2x32xf32>, vector<32x128xf32>, vector<2x128xf32> -> vector<2x128xf32>
    %30 = arith.addf %28, %29 : vector<2x128xf32>
    %31 = arith.negf %30 : vector<2x128xf32>
    %32 = math.exp %31 : vector<2x128xf32>
    %cst_14 = arith.constant 1.000000e+00 : f32
    %33 = vector.broadcast %cst_14 : f32 to vector<2x128xf32>
    %34 = arith.addf %33, %32 : vector<2x128xf32>
    %35 = arith.divf %33, %34 : vector<2x128xf32>
    %36 = math.tanh %30 : vector<2x128xf32>
    %37 = vector.extract_strided_slice %35 {offsets = [0, 0], sizes = [2, 32], strides = [1, 1]} : vector<2x128xf32> to vector<2x32xf32>
    %38 = vector.extract_strided_slice %35 {offsets = [0, 32], sizes = [2, 32], strides = [1, 1]} : vector<2x128xf32> to vector<2x32xf32>
    %39 = vector.extract_strided_slice %36 {offsets = [0, 64], sizes = [2, 32], strides = [1, 1]} : vector<2x128xf32> to vector<2x32xf32>
    %40 = vector.extract_strided_slice %35 {offsets = [0, 96], sizes = [2, 32], strides = [1, 1]} : vector<2x128xf32> to vector<2x32xf32>
    %41 = arith.mulf %38, %24 : vector<2x32xf32>
    %42 = arith.mulf %37, %39 : vector<2x32xf32>
    %43 = arith.addf %41, %42 : vector<2x32xf32>
    %44 = math.tanh %43 : vector<2x32xf32>
    %45 = arith.mulf %40, %44 : vector<2x32xf32>
    %c2 = arith.constant 2 : index
    %c0_15 = arith.constant 0 : index
    %46 = vector.load %arg10[%c2, %c0_15] : memref<16x32xf32, #tpu.memory_space<vmem>>, vector<2x32xf32>
    tpu.vector_store %arg10[%c2, %c0_15], %45 {strides = array<i32>} : memref<16x32xf32, #tpu.memory_space<vmem>>, vector<2x32xf32>,
    %47 = vector.extract_strided_slice %6 {offsets = [4, 0], sizes = [2, 128], strides = [1, 1]} : vector<16x128xf32> to vector<2x128xf32>
    %cst_16 = arith.constant dense<0.000000e+00> : vector<2x128xf32>
    %48 = tpu.matmul %45, %2, %cst_16 {dimension_numbers = #tpu.dot_dimension_numbers<[1], [0], [0], [1], [0, 0, 1, 1], [], []>} : vector<2x32xf32>, vector<32x128xf32>, vector<2x128xf32> -> vector<2x128xf32>
    %49 = arith.addf %47, %48 : vector<2x128xf32>
    %50 = arith.negf %49 : vector<2x128xf32>
    %51 = math.exp %50 : vector<2x128xf32>
    %cst_17 = arith.constant 1.000000e+00 : f32
    %52 = vector.broadcast %cst_17 : f32 to vector<2x128xf32>
    %53 = arith.addf %52, %51 : vector<2x128xf32>
    %54 = arith.divf %52, %53 : vector<2x128xf32>
    %55 = math.tanh %49 : vector<2x128xf32>
    %56 = vector.extract_strided_slice %54 {offsets = [0, 0], sizes = [2, 32], strides = [1, 1]} : vector<2x128xf32> to vector<2x32xf32>
    %57 = vector.extract_strided_slice %54 {offsets = [0, 32], sizes = [2, 32], strides = [1, 1]} : vector<2x128xf32> to vector<2x32xf32>
    %58 = vector.extract_strided_slice %55 {offsets = [0, 64], sizes = [2, 32], strides = [1, 1]} : vector<2x128xf32> to vector<2x32xf32>
    %59 = vector.extract_strided_slice %54 {offsets = [0, 96], sizes = [2, 32], strides = [1, 1]} : vector<2x128xf32> to vector<2x32xf32>
    %60 = arith.mulf %57, %43 : vector<2x32xf32>
    %61 = arith.mulf %56, %58 : vector<2x32xf32>
    %62 = arith.addf %60, %61 : vector<2x32xf32>
    %63 = math.tanh %62 : vector<2x32xf32>
    %64 = arith.mulf %59, %63 : vector<2x32xf32>
    %c4 = arith.constant 4 : index
    %c0_18 = arith.constant 0 : index
    %65 = vector.load %arg10[%c4, %c0_18] : memref<16x32xf32, #tpu.memory_space<vmem>>, vector<2x32xf32>
    tpu.vector_store %arg10[%c4, %c0_18], %64 {strides = array<i32>} : memref<16x32xf32, #tpu.memory_space<vmem>>, vector<2x32xf32>,
    %66 = vector.extract_strided_slice %6 {offsets = [6, 0], sizes = [2, 128], strides = [1, 1]} : vector<16x128xf32> to vector<2x128xf32>
    %cst_19 = arith.constant dense<0.000000e+00> : vector<2x128xf32>
    %67 = tpu.matmul %64, %2, %cst_19 {dimension_numbers = #tpu.dot_dimension_numbers<[1], [0], [0], [1], [0, 0, 1, 1], [], []>} : vector<2x32xf32>, vector<32x128xf32>, vector<2x128xf32> -> vector<2x128xf32>
    %68 = arith.addf %66, %67 : vector<2x128xf32>
    %69 = arith.negf %68 : vector<2x128xf32>
    %70 = math.exp %69 : vector<2x128xf32>
    %cst_20 = arith.constant 1.000000e+00 : f32
    %71 = vector.broadcast %cst_20 : f32 to vector<2x128xf32>
    %72 = arith.addf %71, %70 : vector<2x128xf32>
    %73 = arith.divf %71, %72 : vector<2x128xf32>
    %74 = math.tanh %68 : vector<2x128xf32>
    %75 = vector.extract_strided_slice %73 {offsets = [0, 0], sizes = [2, 32], strides = [1, 1]} : vector<2x128xf32> to vector<2x32xf32>
    %76 = vector.extract_strided_slice %73 {offsets = [0, 32], sizes = [2, 32], strides = [1, 1]} : vector<2x128xf32> to vector<2x32xf32>
    %77 = vector.extract_strided_slice %74 {offsets = [0, 64], sizes = [2, 32], strides = [1, 1]} : vector<2x128xf32> to vector<2x32xf32>
    %78 = vector.extract_strided_slice %73 {offsets = [0, 96], sizes = [2, 32], strides = [1, 1]} : vector<2x128xf32> to vector<2x32xf32>
    %79 = arith.mulf %76, %62 : vector<2x32xf32>
    %80 = arith.mulf %75, %77 : vector<2x32xf32>
    %81 = arith.addf %79, %80 : vector<2x32xf32>
    %82 = math.tanh %81 : vector<2x32xf32>
    %83 = arith.mulf %78, %82 : vector<2x32xf32>
    %c6 = arith.constant 6 : index
    %c0_21 = arith.constant 0 : index
    %84 = vector.load %arg10[%c6, %c0_21] : memref<16x32xf32, #tpu.memory_space<vmem>>, vector<2x32xf32>
    tpu.vector_store %arg10[%c6, %c0_21], %83 {strides = array<i32>} : memref<16x32xf32, #tpu.memory_space<vmem>>, vector<2x32xf32>,
    %85 = vector.extract_strided_slice %6 {offsets = [8, 0], sizes = [2, 128], strides = [1, 1]} : vector<16x128xf32> to vector<2x128xf32>
    %cst_22 = arith.constant dense<0.000000e+00> : vector<2x128xf32>
    %86 = tpu.matmul %83, %2, %cst_22 {dimension_numbers = #tpu.dot_dimension_numbers<[1], [0], [0], [1], [0, 0, 1, 1], [], []>} : vector<2x32xf32>, vector<32x128xf32>, vector<2x128xf32> -> vector<2x128xf32>
    %87 = arith.addf %85, %86 : vector<2x128xf32>
    %88 = arith.negf %87 : vector<2x128xf32>
    %89 = math.exp %88 : vector<2x128xf32>
    %cst_23 = arith.constant 1.000000e+00 : f32
    %90 = vector.broadcast %cst_23 : f32 to vector<2x128xf32>
    %91 = arith.addf %90, %89 : vector<2x128xf32>
    %92 = arith.divf %90, %91 : vector<2x128xf32>
    %93 = math.tanh %87 : vector<2x128xf32>
    %94 = vector.extract_strided_slice %92 {offsets = [0, 0], sizes = [2, 32], strides = [1, 1]} : vector<2x128xf32> to vector<2x32xf32>
    %95 = vector.extract_strided_slice %92 {offsets = [0, 32], sizes = [2, 32], strides = [1, 1]} : vector<2x128xf32> to vector<2x32xf32>
    %96 = vector.extract_strided_slice %93 {offsets = [0, 64], sizes = [2, 32], strides = [1, 1]} : vector<2x128xf32> to vector<2x32xf32>
    %97 = vector.extract_strided_slice %92 {offsets = [0, 96], sizes = [2, 32], strides = [1, 1]} : vector<2x128xf32> to vector<2x32xf32>
    %98 = arith.mulf %95, %81 : vector<2x32xf32>
    %99 = arith.mulf %94, %96 : vector<2x32xf32>
    %100 = arith.addf %98, %99 : vector<2x32xf32>
    %101 = math.tanh %100 : vector<2x32xf32>
    %102 = arith.mulf %97, %101 : vector<2x32xf32>
    %c8 = arith.constant 8 : index
    %c0_24 = arith.constant 0 : index
    %103 = vector.load %arg10[%c8, %c0_24] : memref<16x32xf32, #tpu.memory_space<vmem>>, vector<2x32xf32>
    tpu.vector_store %arg10[%c8, %c0_24], %102 {strides = array<i32>} : memref<16x32xf32, #tpu.memory_space<vmem>>, vector<2x32xf32>,
    %104 = vector.extract_strided_slice %6 {offsets = [10, 0], sizes = [2, 128], strides = [1, 1]} : vector<16x128xf32> to vector<2x128xf32>
    %cst_25 = arith.constant dense<0.000000e+00> : vector<2x128xf32>
    %105 = tpu.matmul %102, %2, %cst_25 {dimension_numbers = #tpu.dot_dimension_numbers<[1], [0], [0], [1], [0, 0, 1, 1], [], []>} : vector<2x32xf32>, vector<32x128xf32>, vector<2x128xf32> -> vector<2x128xf32>
    %106 = arith.addf %104, %105 : vector<2x128xf32>
    %107 = arith.negf %106 : vector<2x128xf32>
    %108 = math.exp %107 : vector<2x128xf32>
    %cst_26 = arith.constant 1.000000e+00 : f32
    %109 = vector.broadcast %cst_26 : f32 to vector<2x128xf32>
    %110 = arith.addf %109, %108 : vector<2x128xf32>
    %111 = arith.divf %109, %110 : vector<2x128xf32>
    %112 = math.tanh %106 : vector<2x128xf32>
    %113 = vector.extract_strided_slice %111 {offsets = [0, 0], sizes = [2, 32], strides = [1, 1]} : vector<2x128xf32> to vector<2x32xf32>
    %114 = vector.extract_strided_slice %111 {offsets = [0, 32], sizes = [2, 32], strides = [1, 1]} : vector<2x128xf32> to vector<2x32xf32>
    %115 = vector.extract_strided_slice %112 {offsets = [0, 64], sizes = [2, 32], strides = [1, 1]} : vector<2x128xf32> to vector<2x32xf32>
    %116 = vector.extract_strided_slice %111 {offsets = [0, 96], sizes = [2, 32], strides = [1, 1]} : vector<2x128xf32> to vector<2x32xf32>
    %117 = arith.mulf %114, %100 : vector<2x32xf32>
    %118 = arith.mulf %113, %115 : vector<2x32xf32>
    %119 = arith.addf %117, %118 : vector<2x32xf32>
    %120 = math.tanh %119 : vector<2x32xf32>
    %121 = arith.mulf %116, %120 : vector<2x32xf32>
    %c10 = arith.constant 10 : index
    %c0_27 = arith.constant 0 : index
    %122 = vector.load %arg10[%c10, %c0_27] : memref<16x32xf32, #tpu.memory_space<vmem>>, vector<2x32xf32>
    tpu.vector_store %arg10[%c10, %c0_27], %121 {strides = array<i32>} : memref<16x32xf32, #tpu.memory_space<vmem>>, vector<2x32xf32>,
    %123 = vector.extract_strided_slice %6 {offsets = [12, 0], sizes = [2, 128], strides = [1, 1]} : vector<16x128xf32> to vector<2x128xf32>
    %cst_28 = arith.constant dense<0.000000e+00> : vector<2x128xf32>
    %124 = tpu.matmul %121, %2, %cst_28 {dimension_numbers = #tpu.dot_dimension_numbers<[1], [0], [0], [1], [0, 0, 1, 1], [], []>} : vector<2x32xf32>, vector<32x128xf32>, vector<2x128xf32> -> vector<2x128xf32>
    %125 = arith.addf %123, %124 : vector<2x128xf32>
    %126 = arith.negf %125 : vector<2x128xf32>
    %127 = math.exp %126 : vector<2x128xf32>
    %cst_29 = arith.constant 1.000000e+00 : f32
    %128 = vector.broadcast %cst_29 : f32 to vector<2x128xf32>
    %129 = arith.addf %128, %127 : vector<2x128xf32>
    %130 = arith.divf %128, %129 : vector<2x128xf32>
    %131 = math.tanh %125 : vector<2x128xf32>
    %132 = vector.extract_strided_slice %130 {offsets = [0, 0], sizes = [2, 32], strides = [1, 1]} : vector<2x128xf32> to vector<2x32xf32>
    %133 = vector.extract_strided_slice %130 {offsets = [0, 32], sizes = [2, 32], strides = [1, 1]} : vector<2x128xf32> to vector<2x32xf32>
    %134 = vector.extract_strided_slice %131 {offsets = [0, 64], sizes = [2, 32], strides = [1, 1]} : vector<2x128xf32> to vector<2x32xf32>
    %135 = vector.extract_strided_slice %130 {offsets = [0, 96], sizes = [2, 32], strides = [1, 1]} : vector<2x128xf32> to vector<2x32xf32>
    %136 = arith.mulf %133, %119 : vector<2x32xf32>
    %137 = arith.mulf %132, %134 : vector<2x32xf32>
    %138 = arith.addf %136, %137 : vector<2x32xf32>
    %139 = math.tanh %138 : vector<2x32xf32>
    %140 = arith.mulf %135, %139 : vector<2x32xf32>
    %c12 = arith.constant 12 : index
    %c0_30 = arith.constant 0 : index
    %141 = vector.load %arg10[%c12, %c0_30] : memref<16x32xf32, #tpu.memory_space<vmem>>, vector<2x32xf32>
    tpu.vector_store %arg10[%c12, %c0_30], %140 {strides = array<i32>} : memref<16x32xf32, #tpu.memory_space<vmem>>, vector<2x32xf32>,
    %142 = vector.extract_strided_slice %6 {offsets = [14, 0], sizes = [2, 128], strides = [1, 1]} : vector<16x128xf32> to vector<2x128xf32>
    %cst_31 = arith.constant dense<0.000000e+00> : vector<2x128xf32>
    %143 = tpu.matmul %140, %2, %cst_31 {dimension_numbers = #tpu.dot_dimension_numbers<[1], [0], [0], [1], [0, 0, 1, 1], [], []>} : vector<2x32xf32>, vector<32x128xf32>, vector<2x128xf32> -> vector<2x128xf32>
    %144 = arith.addf %142, %143 : vector<2x128xf32>
    %145 = arith.negf %144 : vector<2x128xf32>
    %146 = math.exp %145 : vector<2x128xf32>
    %cst_32 = arith.constant 1.000000e+00 : f32
    %147 = vector.broadcast %cst_32 : f32 to vector<2x128xf32>
    %148 = arith.addf %147, %146 : vector<2x128xf32>
    %149 = arith.divf %147, %148 : vector<2x128xf32>
    %150 = math.tanh %144 : vector<2x128xf32>
    %151 = vector.extract_strided_slice %149 {offsets = [0, 0], sizes = [2, 32], strides = [1, 1]} : vector<2x128xf32> to vector<2x32xf32>
    %152 = vector.extract_strided_slice %149 {offsets = [0, 32], sizes = [2, 32], strides = [1, 1]} : vector<2x128xf32> to vector<2x32xf32>
    %153 = vector.extract_strided_slice %150 {offsets = [0, 64], sizes = [2, 32], strides = [1, 1]} : vector<2x128xf32> to vector<2x32xf32>
    %154 = vector.extract_strided_slice %149 {offsets = [0, 96], sizes = [2, 32], strides = [1, 1]} : vector<2x128xf32> to vector<2x32xf32>
    %155 = arith.mulf %152, %138 : vector<2x32xf32>
    %156 = arith.mulf %151, %153 : vector<2x32xf32>
    %157 = arith.addf %155, %156 : vector<2x32xf32>
    %158 = math.tanh %157 : vector<2x32xf32>
    %159 = arith.mulf %154, %158 : vector<2x32xf32>
    %c14 = arith.constant 14 : index
    %c0_33 = arith.constant 0 : index
    %160 = vector.load %arg10[%c14, %c0_33] : memref<16x32xf32, #tpu.memory_space<vmem>>, vector<2x32xf32>
    tpu.vector_store %arg10[%c14, %c0_33], %159 {strides = array<i32>} : memref<16x32xf32, #tpu.memory_space<vmem>>, vector<2x32xf32>,
    %c0_34 = arith.constant 0 : index
    %c0_35 = arith.constant 0 : index
    %161 = vector.load %arg10[%c0_34, %c0_35] : memref<16x32xf32, #tpu.memory_space<vmem>>, vector<16x32xf32>
    %c0_36 = arith.constant 0 : index
    %c0_37 = arith.constant 0 : index
    %162 = vector.load %arg4[%c0_36, %c0_37] : memref<32x128xf32, #tpu.memory_space<vmem>>, vector<32x128xf32>
    %c0_38 = arith.constant 0 : index
    %c0_39 = arith.constant 0 : index
    %163 = vector.load %arg5[%c0_38, %c0_39] : memref<32x128xf32, #tpu.memory_space<vmem>>, vector<32x128xf32>
    %c0_40 = arith.constant 0 : index
    %c0_41 = arith.constant 0 : index
    %164 = vector.load %arg6[%c0_40, %c0_41] : memref<1x128xf32, #tpu.memory_space<vmem>>, vector<1x128xf32>
    %cst_42 = arith.constant dense<0.000000e+00> : vector<16x128xf32>
    %165 = tpu.matmul %161, %162, %cst_42 {dimension_numbers = #tpu.dot_dimension_numbers<[1], [0], [0], [1], [0, 0, 1, 1], [], []>} : vector<16x32xf32>, vector<32x128xf32>, vector<16x128xf32> -> vector<16x128xf32>
    %166 = vector.broadcast %164 : vector<1x128xf32> to vector<16x128xf32>
    %167 = arith.addf %165, %166 : vector<16x128xf32>
    %cst_43 = arith.constant 0.000000e+00 : f32
    %168 = vector.broadcast %cst_43 : f32 to vector<2x32xf32>
    %cst_44 = arith.constant 0.000000e+00 : f32
    %169 = vector.broadcast %cst_44 : f32 to vector<2x32xf32>
    %170 = vector.extract_strided_slice %167 {offsets = [0, 0], sizes = [2, 128], strides = [1, 1]} : vector<16x128xf32> to vector<2x128xf32>
    %cst_45 = arith.constant dense<0.000000e+00> : vector<2x128xf32>
    %171 = tpu.matmul %168, %163, %cst_45 {dimension_numbers = #tpu.dot_dimension_numbers<[1], [0], [0], [1], [0, 0, 1, 1], [], []>} : vector<2x32xf32>, vector<32x128xf32>, vector<2x128xf32> -> vector<2x128xf32>
    %172 = arith.addf %170, %171 : vector<2x128xf32>
    %173 = arith.negf %172 : vector<2x128xf32>
    %174 = math.exp %173 : vector<2x128xf32>
    %cst_46 = arith.constant 1.000000e+00 : f32
    %175 = vector.broadcast %cst_46 : f32 to vector<2x128xf32>
    %176 = arith.addf %175, %174 : vector<2x128xf32>
    %177 = arith.divf %175, %176 : vector<2x128xf32>
    %178 = math.tanh %172 : vector<2x128xf32>
    %179 = vector.extract_strided_slice %177 {offsets = [0, 0], sizes = [2, 32], strides = [1, 1]} : vector<2x128xf32> to vector<2x32xf32>
    %180 = vector.extract_strided_slice %177 {offsets = [0, 32], sizes = [2, 32], strides = [1, 1]} : vector<2x128xf32> to vector<2x32xf32>
    %181 = vector.extract_strided_slice %178 {offsets = [0, 64], sizes = [2, 32], strides = [1, 1]} : vector<2x128xf32> to vector<2x32xf32>
    %182 = vector.extract_strided_slice %177 {offsets = [0, 96], sizes = [2, 32], strides = [1, 1]} : vector<2x128xf32> to vector<2x32xf32>
    %183 = arith.mulf %180, %169 : vector<2x32xf32>
    %184 = arith.mulf %179, %181 : vector<2x32xf32>
    %185 = arith.addf %183, %184 : vector<2x32xf32>
    %186 = math.tanh %185 : vector<2x32xf32>
    %187 = arith.mulf %182, %186 : vector<2x32xf32>
    %188 = vector.extract_strided_slice %167 {offsets = [2, 0], sizes = [2, 128], strides = [1, 1]} : vector<16x128xf32> to vector<2x128xf32>
    %cst_47 = arith.constant dense<0.000000e+00> : vector<2x128xf32>
    %189 = tpu.matmul %187, %163, %cst_47 {dimension_numbers = #tpu.dot_dimension_numbers<[1], [0], [0], [1], [0, 0, 1, 1], [], []>} : vector<2x32xf32>, vector<32x128xf32>, vector<2x128xf32> -> vector<2x128xf32>
    %190 = arith.addf %188, %189 : vector<2x128xf32>
    %191 = arith.negf %190 : vector<2x128xf32>
    %192 = math.exp %191 : vector<2x128xf32>
    %cst_48 = arith.constant 1.000000e+00 : f32
    %193 = vector.broadcast %cst_48 : f32 to vector<2x128xf32>
    %194 = arith.addf %193, %192 : vector<2x128xf32>
    %195 = arith.divf %193, %194 : vector<2x128xf32>
    %196 = math.tanh %190 : vector<2x128xf32>
    %197 = vector.extract_strided_slice %195 {offsets = [0, 0], sizes = [2, 32], strides = [1, 1]} : vector<2x128xf32> to vector<2x32xf32>
    %198 = vector.extract_strided_slice %195 {offsets = [0, 32], sizes = [2, 32], strides = [1, 1]} : vector<2x128xf32> to vector<2x32xf32>
    %199 = vector.extract_strided_slice %196 {offsets = [0, 64], sizes = [2, 32], strides = [1, 1]} : vector<2x128xf32> to vector<2x32xf32>
    %200 = vector.extract_strided_slice %195 {offsets = [0, 96], sizes = [2, 32], strides = [1, 1]} : vector<2x128xf32> to vector<2x32xf32>
    %201 = arith.mulf %198, %185 : vector<2x32xf32>
    %202 = arith.mulf %197, %199 : vector<2x32xf32>
    %203 = arith.addf %201, %202 : vector<2x32xf32>
    %204 = math.tanh %203 : vector<2x32xf32>
    %205 = arith.mulf %200, %204 : vector<2x32xf32>
    %206 = vector.extract_strided_slice %167 {offsets = [4, 0], sizes = [2, 128], strides = [1, 1]} : vector<16x128xf32> to vector<2x128xf32>
    %cst_49 = arith.constant dense<0.000000e+00> : vector<2x128xf32>
    %207 = tpu.matmul %205, %163, %cst_49 {dimension_numbers = #tpu.dot_dimension_numbers<[1], [0], [0], [1], [0, 0, 1, 1], [], []>} : vector<2x32xf32>, vector<32x128xf32>, vector<2x128xf32> -> vector<2x128xf32>
    %208 = arith.addf %206, %207 : vector<2x128xf32>
    %209 = arith.negf %208 : vector<2x128xf32>
    %210 = math.exp %209 : vector<2x128xf32>
    %cst_50 = arith.constant 1.000000e+00 : f32
    %211 = vector.broadcast %cst_50 : f32 to vector<2x128xf32>
    %212 = arith.addf %211, %210 : vector<2x128xf32>
    %213 = arith.divf %211, %212 : vector<2x128xf32>
    %214 = math.tanh %208 : vector<2x128xf32>
    %215 = vector.extract_strided_slice %213 {offsets = [0, 0], sizes = [2, 32], strides = [1, 1]} : vector<2x128xf32> to vector<2x32xf32>
    %216 = vector.extract_strided_slice %213 {offsets = [0, 32], sizes = [2, 32], strides = [1, 1]} : vector<2x128xf32> to vector<2x32xf32>
    %217 = vector.extract_strided_slice %214 {offsets = [0, 64], sizes = [2, 32], strides = [1, 1]} : vector<2x128xf32> to vector<2x32xf32>
    %218 = vector.extract_strided_slice %213 {offsets = [0, 96], sizes = [2, 32], strides = [1, 1]} : vector<2x128xf32> to vector<2x32xf32>
    %219 = arith.mulf %216, %203 : vector<2x32xf32>
    %220 = arith.mulf %215, %217 : vector<2x32xf32>
    %221 = arith.addf %219, %220 : vector<2x32xf32>
    %222 = math.tanh %221 : vector<2x32xf32>
    %223 = arith.mulf %218, %222 : vector<2x32xf32>
    %224 = vector.extract_strided_slice %167 {offsets = [6, 0], sizes = [2, 128], strides = [1, 1]} : vector<16x128xf32> to vector<2x128xf32>
    %cst_51 = arith.constant dense<0.000000e+00> : vector<2x128xf32>
    %225 = tpu.matmul %223, %163, %cst_51 {dimension_numbers = #tpu.dot_dimension_numbers<[1], [0], [0], [1], [0, 0, 1, 1], [], []>} : vector<2x32xf32>, vector<32x128xf32>, vector<2x128xf32> -> vector<2x128xf32>
    %226 = arith.addf %224, %225 : vector<2x128xf32>
    %227 = arith.negf %226 : vector<2x128xf32>
    %228 = math.exp %227 : vector<2x128xf32>
    %cst_52 = arith.constant 1.000000e+00 : f32
    %229 = vector.broadcast %cst_52 : f32 to vector<2x128xf32>
    %230 = arith.addf %229, %228 : vector<2x128xf32>
    %231 = arith.divf %229, %230 : vector<2x128xf32>
    %232 = math.tanh %226 : vector<2x128xf32>
    %233 = vector.extract_strided_slice %231 {offsets = [0, 0], sizes = [2, 32], strides = [1, 1]} : vector<2x128xf32> to vector<2x32xf32>
    %234 = vector.extract_strided_slice %231 {offsets = [0, 32], sizes = [2, 32], strides = [1, 1]} : vector<2x128xf32> to vector<2x32xf32>
    %235 = vector.extract_strided_slice %232 {offsets = [0, 64], sizes = [2, 32], strides = [1, 1]} : vector<2x128xf32> to vector<2x32xf32>
    %236 = vector.extract_strided_slice %231 {offsets = [0, 96], sizes = [2, 32], strides = [1, 1]} : vector<2x128xf32> to vector<2x32xf32>
    %237 = arith.mulf %234, %221 : vector<2x32xf32>
    %238 = arith.mulf %233, %235 : vector<2x32xf32>
    %239 = arith.addf %237, %238 : vector<2x32xf32>
    %240 = math.tanh %239 : vector<2x32xf32>
    %241 = arith.mulf %236, %240 : vector<2x32xf32>
    %242 = vector.extract_strided_slice %167 {offsets = [8, 0], sizes = [2, 128], strides = [1, 1]} : vector<16x128xf32> to vector<2x128xf32>
    %cst_53 = arith.constant dense<0.000000e+00> : vector<2x128xf32>
    %243 = tpu.matmul %241, %163, %cst_53 {dimension_numbers = #tpu.dot_dimension_numbers<[1], [0], [0], [1], [0, 0, 1, 1], [], []>} : vector<2x32xf32>, vector<32x128xf32>, vector<2x128xf32> -> vector<2x128xf32>
    %244 = arith.addf %242, %243 : vector<2x128xf32>
    %245 = arith.negf %244 : vector<2x128xf32>
    %246 = math.exp %245 : vector<2x128xf32>
    %cst_54 = arith.constant 1.000000e+00 : f32
    %247 = vector.broadcast %cst_54 : f32 to vector<2x128xf32>
    %248 = arith.addf %247, %246 : vector<2x128xf32>
    %249 = arith.divf %247, %248 : vector<2x128xf32>
    %250 = math.tanh %244 : vector<2x128xf32>
    %251 = vector.extract_strided_slice %249 {offsets = [0, 0], sizes = [2, 32], strides = [1, 1]} : vector<2x128xf32> to vector<2x32xf32>
    %252 = vector.extract_strided_slice %249 {offsets = [0, 32], sizes = [2, 32], strides = [1, 1]} : vector<2x128xf32> to vector<2x32xf32>
    %253 = vector.extract_strided_slice %250 {offsets = [0, 64], sizes = [2, 32], strides = [1, 1]} : vector<2x128xf32> to vector<2x32xf32>
    %254 = vector.extract_strided_slice %249 {offsets = [0, 96], sizes = [2, 32], strides = [1, 1]} : vector<2x128xf32> to vector<2x32xf32>
    %255 = arith.mulf %252, %239 : vector<2x32xf32>
    %256 = arith.mulf %251, %253 : vector<2x32xf32>
    %257 = arith.addf %255, %256 : vector<2x32xf32>
    %258 = math.tanh %257 : vector<2x32xf32>
    %259 = arith.mulf %254, %258 : vector<2x32xf32>
    %260 = vector.extract_strided_slice %167 {offsets = [10, 0], sizes = [2, 128], strides = [1, 1]} : vector<16x128xf32> to vector<2x128xf32>
    %cst_55 = arith.constant dense<0.000000e+00> : vector<2x128xf32>
    %261 = tpu.matmul %259, %163, %cst_55 {dimension_numbers = #tpu.dot_dimension_numbers<[1], [0], [0], [1], [0, 0, 1, 1], [], []>} : vector<2x32xf32>, vector<32x128xf32>, vector<2x128xf32> -> vector<2x128xf32>
    %262 = arith.addf %260, %261 : vector<2x128xf32>
    %263 = arith.negf %262 : vector<2x128xf32>
    %264 = math.exp %263 : vector<2x128xf32>
    %cst_56 = arith.constant 1.000000e+00 : f32
    %265 = vector.broadcast %cst_56 : f32 to vector<2x128xf32>
    %266 = arith.addf %265, %264 : vector<2x128xf32>
    %267 = arith.divf %265, %266 : vector<2x128xf32>
    %268 = math.tanh %262 : vector<2x128xf32>
    %269 = vector.extract_strided_slice %267 {offsets = [0, 0], sizes = [2, 32], strides = [1, 1]} : vector<2x128xf32> to vector<2x32xf32>
    %270 = vector.extract_strided_slice %267 {offsets = [0, 32], sizes = [2, 32], strides = [1, 1]} : vector<2x128xf32> to vector<2x32xf32>
    %271 = vector.extract_strided_slice %268 {offsets = [0, 64], sizes = [2, 32], strides = [1, 1]} : vector<2x128xf32> to vector<2x32xf32>
    %272 = vector.extract_strided_slice %267 {offsets = [0, 96], sizes = [2, 32], strides = [1, 1]} : vector<2x128xf32> to vector<2x32xf32>
    %273 = arith.mulf %270, %257 : vector<2x32xf32>
    %274 = arith.mulf %269, %271 : vector<2x32xf32>
    %275 = arith.addf %273, %274 : vector<2x32xf32>
    %276 = math.tanh %275 : vector<2x32xf32>
    %277 = arith.mulf %272, %276 : vector<2x32xf32>
    %278 = vector.extract_strided_slice %167 {offsets = [12, 0], sizes = [2, 128], strides = [1, 1]} : vector<16x128xf32> to vector<2x128xf32>
    %cst_57 = arith.constant dense<0.000000e+00> : vector<2x128xf32>
    %279 = tpu.matmul %277, %163, %cst_57 {dimension_numbers = #tpu.dot_dimension_numbers<[1], [0], [0], [1], [0, 0, 1, 1], [], []>} : vector<2x32xf32>, vector<32x128xf32>, vector<2x128xf32> -> vector<2x128xf32>
    %280 = arith.addf %278, %279 : vector<2x128xf32>
    %281 = arith.negf %280 : vector<2x128xf32>
    %282 = math.exp %281 : vector<2x128xf32>
    %cst_58 = arith.constant 1.000000e+00 : f32
    %283 = vector.broadcast %cst_58 : f32 to vector<2x128xf32>
    %284 = arith.addf %283, %282 : vector<2x128xf32>
    %285 = arith.divf %283, %284 : vector<2x128xf32>
    %286 = math.tanh %280 : vector<2x128xf32>
    %287 = vector.extract_strided_slice %285 {offsets = [0, 0], sizes = [2, 32], strides = [1, 1]} : vector<2x128xf32> to vector<2x32xf32>
    %288 = vector.extract_strided_slice %285 {offsets = [0, 32], sizes = [2, 32], strides = [1, 1]} : vector<2x128xf32> to vector<2x32xf32>
    %289 = vector.extract_strided_slice %286 {offsets = [0, 64], sizes = [2, 32], strides = [1, 1]} : vector<2x128xf32> to vector<2x32xf32>
    %290 = vector.extract_strided_slice %285 {offsets = [0, 96], sizes = [2, 32], strides = [1, 1]} : vector<2x128xf32> to vector<2x32xf32>
    %291 = arith.mulf %288, %275 : vector<2x32xf32>
    %292 = arith.mulf %287, %289 : vector<2x32xf32>
    %293 = arith.addf %291, %292 : vector<2x32xf32>
    %294 = math.tanh %293 : vector<2x32xf32>
    %295 = arith.mulf %290, %294 : vector<2x32xf32>
    %296 = vector.extract_strided_slice %167 {offsets = [14, 0], sizes = [2, 128], strides = [1, 1]} : vector<16x128xf32> to vector<2x128xf32>
    %cst_59 = arith.constant dense<0.000000e+00> : vector<2x128xf32>
    %297 = tpu.matmul %295, %163, %cst_59 {dimension_numbers = #tpu.dot_dimension_numbers<[1], [0], [0], [1], [0, 0, 1, 1], [], []>} : vector<2x32xf32>, vector<32x128xf32>, vector<2x128xf32> -> vector<2x128xf32>
    %298 = arith.addf %296, %297 : vector<2x128xf32>
    %299 = arith.negf %298 : vector<2x128xf32>
    %300 = math.exp %299 : vector<2x128xf32>
    %cst_60 = arith.constant 1.000000e+00 : f32
    %301 = vector.broadcast %cst_60 : f32 to vector<2x128xf32>
    %302 = arith.addf %301, %300 : vector<2x128xf32>
    %303 = arith.divf %301, %302 : vector<2x128xf32>
    %304 = math.tanh %298 : vector<2x128xf32>
    %305 = vector.extract_strided_slice %303 {offsets = [0, 0], sizes = [2, 32], strides = [1, 1]} : vector<2x128xf32> to vector<2x32xf32>
    %306 = vector.extract_strided_slice %303 {offsets = [0, 32], sizes = [2, 32], strides = [1, 1]} : vector<2x128xf32> to vector<2x32xf32>
    %307 = vector.extract_strided_slice %304 {offsets = [0, 64], sizes = [2, 32], strides = [1, 1]} : vector<2x128xf32> to vector<2x32xf32>
    %308 = vector.extract_strided_slice %303 {offsets = [0, 96], sizes = [2, 32], strides = [1, 1]} : vector<2x128xf32> to vector<2x32xf32>
    %309 = arith.mulf %306, %293 : vector<2x32xf32>
    %310 = arith.mulf %305, %307 : vector<2x32xf32>
    %311 = arith.addf %309, %310 : vector<2x32xf32>
    %312 = math.tanh %311 : vector<2x32xf32>
    %313 = arith.mulf %308, %312 : vector<2x32xf32>
    %c0_61 = arith.constant 0 : index
    %c0_62 = arith.constant 0 : index
    %314 = vector.load %arg7[%c0_61, %c0_62] : memref<32x4xf32, #tpu.memory_space<vmem>>, vector<32x4xf32>
    %cst_63 = arith.constant dense<0.000000e+00> : vector<2x4xf32>
    %315 = tpu.matmul %313, %314, %cst_63 {dimension_numbers = #tpu.dot_dimension_numbers<[1], [0], [0], [1], [0, 0, 1, 1], [], []>} : vector<2x32xf32>, vector<32x4xf32>, vector<2x4xf32> -> vector<2x4xf32>
    %c0_64 = arith.constant 0 : index
    %c0_65 = arith.constant 0 : index
    %316 = vector.load %arg8[%c0_64, %c0_65] : memref<1x4xf32, #tpu.memory_space<vmem>>, vector<1x4xf32>
    %317 = vector.broadcast %316 : vector<1x4xf32> to vector<2x4xf32>
    %318 = arith.addf %315, %317 : vector<2x4xf32>
    %c0_66 = arith.constant 0 : index
    %c0_67 = arith.constant 0 : index
    %319 = vector.load %arg9[%c0_66, %c0_67] : memref<2x4xf32, #tpu.memory_space<vmem>>, vector<2x4xf32>
    tpu.vector_store %arg9[%c0_66, %c0_67], %318 {strides = array<i32>} : memref<2x4xf32, #tpu.memory_space<vmem>>, vector<2x4xf32>,
    return
  }
}

</mosaic_0001>

<bundles_post_ra>
// kernel: tpu_custom_call.1
= control target key start
LH: loop header
LB: loop body
LE: loop exit
PB: predicated region body
PF: predicated region fallthrough
CT: control target
= control target key end

     0   :  { %14 = vsyncpa [#allocation4], 0  ;;  %s3048_s0 = inlined_call_operand.vmem [shape: f32[16,8], index: 0, kind: input, shape index: {}]   ;;  %s3049_s1 = inlined_call_operand.hbm [shape: f32[8,128], index: 1, kind: input, shape index: {}]   ;;  %s3050_s2 = inlined_call_operand.vmem [shape: f32[32,128], index: 2, kind: input, shape index: {}]   ;;  %s3051_s3 = inlined_call_operand.vmem [shape: f32[1,128], index: 3, kind: input, shape index: {}]   ;;  %s3052_s4 = inlined_call_operand.vmem [shape: f32[32,128], index: 4, kind: input, shape index: {}]   ;;  %s3053_s5 = inlined_call_operand.hbm [shape: f32[32,128], index: 5, kind: input, shape index: {}]   ;;  %s3054_s6 = inlined_call_operand.vmem [shape: f32[1,128], index: 6, kind: input, shape index: {}]   ;;  %s3055_s7 = inlined_call_operand.vmem [shape: f32[32,4], index: 7, kind: input, shape index: {}]   ;;  %s3056_s8 = inlined_call_operand.vmem [shape: f32[1,4], index: 8, kind: input, shape index: {}]   ;;  %s3057_s9 = inlined_call_operand.hbm [shape: f32[2,4], index: 9, kind: output, shape index: {}]  }
   0x1   :  { %15 = vsyncpa [#allocation7], 0 }
   0x2   :  { %16 = vsyncpa [#allocation5], 0  ;;  %s2611_s30 = smov [#allocation3]   ;;  %s2612_s11 = smov [#allocation6]  }
   0x3   :  { %s25_s10 = sshll.u32 %s2611_s30, 4  ;;  %s40_s12 = sshll.u32 %s2612_s11, 4  ;;  %s26_s10 = int_to_ptr.vmem [resolvable:$true] %s25_s10  ;;  %s41_s12 = int_to_ptr.vmem [resolvable:$true] %s40_s12 }
   0x4   :  { %s2553_s13 = scalar_lea.vmem %s26_s10, 128  ;;  %p2558_p1 = scmp.lt.s32.totalorder %s26_s10, %s26_s10 }
   0x5   :  { %p2554_p0 = scmp.ne.s32.totalorder %s26_s10, %s2553_s13  ;;  %p2559_p2 = scmp.lt.s32.totalorder %s2553_s13, %s2553_s13 }
   0x7   :  { %p2560_p3 = por %p2559_p2, %p2558_p1 }
   0x9   :  { %p2561_p4 = pnand %p2560_p3, %p2554_p0 }
   0xb   :  { %2564 = shalt.err (!%p2561_p4)
}
   0xc   :  { %28 = dma.hbm_to_vmem [thread:$0]  %s3049_s1, 128, %s26_s10, [#allocation4]  }
   0xd   :  { %s2573_s16 = scalar_lea.vmem %s41_s12, 512  ;;  %p2578_p6 = scmp.lt.s32.totalorder %s41_s12, %s41_s12 }
   0xe   :  { %p2574_p5 = scmp.ne.s32.totalorder %s41_s12, %s2573_s16  ;;  %p2579_p7 = scmp.lt.s32.totalorder %s2573_s16, %s2573_s16 }
  0x10   :  { %p2580_p8 = por %p2579_p7, %p2578_p6 }
  0x12   :  { %p2581_p9 = pnand %p2580_p8, %p2574_p5 }
  0x14   :  { %2584 = shalt.err (!%p2581_p9)
}
  0x15   :  { %s2613_s17 = smov 128   ;;  %s2614_s18 = smov 8  }
  0x16   :  { %46 = dma.hbm_to_vmem [thread:$0]  %s3053_s5, 512, %s41_s12, [#allocation7], %s2613_s17, %s2613_s17, %s2614_s18  }
  0x17   :  { %2605 = dma.done.wait [#allocation4], 128  }
  0x18   :  { %2606 = vsyncadd [#allocation4], 4294967168 }
  0x19   :  { %2607 = dma.done.wait [#allocation7], 512  }
  0x1a   :  { %2608 = vsyncadd [#allocation7], 4294966784  ;;  %v2615_v0 = vmov 0.0   ;;  %vm2616_vm0 = vmmov 0   ;;  %vm73_vm1 = vcmask 64512   ;;  %v61_v1 = vld [vmem:[#allocation3] sm:$0xff] }
  0x1b   :  { %2210 = vmatprep.subr.mxu1 %v2615_v0  ;;  %2218 = vmatprep.mubr.msk.f32.mxu1 %vm2616_vm0, %v2615_v0  ;;  %v2682_v2 = vld [vmem:[%s3050_s2 + $0x18] sm:$0xff]  ;;  %v59_v3 = vld [vmem:[%s3048_s0] sm:$0xff]  ;;  %v60_v4 = vld [vmem:[%s3048_s0 + $0x8] sm:$0xff]  ;;  %s2617_s10 = smov 64   ;;  %vm258_vm2 = vcmask 254976   ;;  %vm155_vm3 = vcmask 261120  }
  0x1c   :  { %2205 = vmatprep.subr.mxu0 %v61_v1  ;;  %2211 = vmatpush3.msra.mxu1 %v2682_v2  ;;  %v2694_v5 = vld [vmem:[%s3050_s2 + $0x10] sm:$0xff]  ;;  %v2700_v6 = vld [vmem:[%s3050_s2 + $0x8] sm:$0xff]  ;;  %v2708_v7 = vld [vmem:[%s3050_s2] sm:$0xff]  ;;  %vm367_vm4 = vcmask 257026   ;;  %vm591_vm5 = vcmask 261126   ;;  %vm479_vm6 = vcmask 259076  }
  0x1d   :  { %2206 = vmatpush3.msra.mxu0 %v61_v1  ;;  %2207 = vmatprep.mubr.msk.f32.mxu0 %vm73_vm1, %v59_v3  ;;  %v2073_v8 = vld [vmem:[%s3051_s3] ss:$0 sm:$0xff]  ;;  %s2618_s3 = smov 32   ;;  %vm2055_vm7 = vcmask 25600  }
  0x1e   :  { %2212 = vmatprep.subr.mxu1 %v2615_v0  ;;  %2208 = vmatmul.mubr.msk.f32.vlgmr.msra.gmra.mxu0 %vm73_vm1, %v60_v4 }
  0x1f   :  { %2213 = vmatpush3.msra.mxu1 %v2694_v5  ;;  %2221 = vmatprep.subr.mxu0 %v2615_v0 }
  0x20   :  { %2214 = vmatprep.subr.mxu1 %v2615_v0  ;;  %2222 = vmatpush3.msra.mxu0 %v2682_v2 }
  0x21   :  { %2215 = vmatpush3.msra.mxu1 %v2700_v6  ;;  %2223 = vmatprep.subr.mxu0 %v2615_v0 }
  0x22   :  { %2216 = vmatprep.subr.mxu1 %v2615_v0  ;;  %2224 = vmatpush3.msra.mxu0 %v2694_v5 }
  0x23   :  { %2217 = vmatpush3.msra.mxu1 %v2708_v7  ;;  %2225 = vmatprep.subr.mxu0 %v2615_v0 }
  0x24   :  { %2219 = vmatmul.mubr.f32.vlgmr.msra.gmra.mxu1 %v2615_v0  ;;  %2226 = vmatpush3.msra.mxu0 %v2700_v6 }
  0x25   :  { %2227 = vmatprep.subr.mxu0 %v2615_v0  ;;  %2229 = vmatprep.mubr.msk.f32.mxu0 %vm2616_vm0, %v2615_v0 }
  0x26   :  { %2228 = vmatpush3.msra.mxu0 %v2708_v7  ;;  %2232 = vmatprep.subr.mxu1 %v2615_v0 }
  0x27   :  { %2233 = vmatpush3.msra.mxu1 %v2682_v2  ;;  %2240 = vmatprep.mubr.msk.f32.mxu1 %vm2616_vm0, %v2615_v0 }
  0x28   :  { %2234 = vmatprep.subr.mxu1 %v2615_v0  ;;  %2243 = vmatprep.subr.mxu0 %v2615_v0 }
  0x29   :  { %2235 = vmatpush3.msra.mxu1 %v2694_v5 }
  0x2a   :  { %2236 = vmatprep.subr.mxu1 %v2615_v0 }
  0x2b   :  { %2237 = vmatpush3.msra.mxu1 %v2700_v6 }
  0x2c   :  { %2238 = vmatprep.subr.mxu1 %v2615_v0 }
  0x2d   :  { %2239 = vmatpush3.msra.mxu1 %v2708_v7 }
  0x2e   :  { %2254 = vmatprep.subr.mxu1 %v2615_v0 }
  0xde   :  { %v2209_v9 = vpop.f32.mrf.mxu0 }
  0xdf   :  { %v2738_v10 = vadd.f32 %v2209_v9, %v2073_v8 }
  0xe0   :  { %v146_v11 = vpop.f32.mrf.mxu0 }
  0xe1   :  { %v2740_v12 = vadd.f32 %v2073_v8, %v146_v11 }
  0xe4   :  { %v225_v13 = vpop.f32.mrf.mxu1 }
  0xe5   :  { %v229_v14 = vadd.f32 %v225_v13, %v2740_v12 }
  0xe6   :  { %v2220_v15 = vpop.f32.mrf.mxu1 }
  0xe7   :  { %2417 = vtanh.f32 %v229_v14  ;;  %v2076_v17 = vmul.f32 -1.442695, %v229_v14 }
  0xe9   :  { %2419 = vpow2.f32 %v2076_v17 }
  0xf4   :  { %v2418_v16 = vpop.eup %2417 }
  0xf5   :  { %239 = vrot.lane.b32.xlu0 %v2418_v16, %s2617_s10 }
  0xf6   :  { %v2420_v18 = vpop.eup %2419 }
  0xf7   :  { %v233_v19 = vadd.f32 1.0, %v2420_v18 }
  0xf9   :  { %2421 = vrcp.f32 %v233_v19 }
 0x106   :  { %v2422_v20 = vpop.eup %2421 }
 0x107   :  { %v237_v23 = vmul.f32 0.0, %v2422_v20 }
 0x167   :  { %v240_v21 = vpop.permute.xlu0 %239 }
 0x168   :  { %v242_v22 = vmul.f32 %v2422_v20, %v240_v21 }
 0x16a   :  { %244 = vrot.lane.b32.xlu0 %v242_v22, %s2618_s3 }
 0x1dc   :  { %v245_v24 = vpop.permute.xlu0 %244 }
 0x1dd   :  { %v247_v25 = vadd.f32 %v245_v24, %v237_v23 }
 0x1df   :  { %2423 = vtanh.f32 %v247_v25  ;;  %v344_v41 = vrot.slane %v247_v25, 6 }
 0x1ec   :  { %v2424_v26 = vpop.eup %2423 }
 0x1ed   :  { %250 = vrot.lane.b32.xlu1 %v2424_v26, %s2617_s10 }
 0x25f   :  { %v251_v27 = vpop.permute.xlu1 %250 }
 0x260   :  { %v253_v28 = vmul.f32 %v2422_v20, %v251_v27 }
 0x262   :  { %255 = vrot.lane.b32.xlu1 %v253_v28, %s2618_s3 }
 0x2d4   :  { %v256_v29 = vpop.permute.xlu1 %255 }
 0x2d5   :  { %259 = vst.msk [vmem:[#allocation2] sm:$0x3] %vm258_vm2, %v256_v29  ;;  %2230 = vmatmul.mubr.msk.f32.vlgmr.msra.gmra.mxu0 %vm155_vm3, %v256_v29 }
 0x2d6   :  { %2244 = vmatpush3.msra.mxu0 %v2682_v2  ;;  %2251 = vmatprep.mubr.msk.f32.mxu0 %vm2616_vm0, %v2615_v0 }
 0x2d7   :  { %2245 = vmatprep.subr.mxu0 %v2615_v0 }
 0x2d8   :  { %2246 = vmatpush3.msra.mxu0 %v2694_v5 }
 0x2d9   :  { %2247 = vmatprep.subr.mxu0 %v2615_v0 }
 0x2da   :  { %2248 = vmatpush3.msra.mxu0 %v2700_v6 }
 0x2db   :  { %2249 = vmatprep.subr.mxu0 %v2615_v0 }
 0x2dc   :  { %2250 = vmatpush3.msra.mxu0 %v2708_v7 }
 0x2dd   :  { %2265 = vmatprep.subr.mxu0 %v2615_v0 }
 0x395   :  { %v328_v30 = vpop.f32.mrf.mxu0 }
 0x396   :  { %v333_v31 = vrot.slane %v328_v30, 6 }
 0x397   :  { %v2231_v32 = vpop.f32.mrf.mxu0 }
 0x398   :  { %v335_v33 = vadd.f32 %v333_v31, %v2740_v12 }
 0x39a   :  { %2425 = vtanh.f32 %v335_v33  ;;  %v2078_v35 = vmul.f32 -1.442695, %v335_v33 }
 0x39c   :  { %2427 = vpow2.f32 %v2078_v35 }
 0x3a7   :  { %v2426_v34 = vpop.eup %2425 }
 0x3a8   :  { %348 = vrot.lane.b32.xlu0 %v2426_v34, %s2617_s10 }
 0x3a9   :  { %v2428_v36 = vpop.eup %2427 }
 0x3aa   :  { %v339_v37 = vadd.f32 1.0, %v2428_v36 }
 0x3ac   :  { %2429 = vrcp.f32 %v339_v37 }
 0x3b9   :  { %v2430_v38 = vpop.eup %2429 }
 0x3ba   :  { %v346_v42 = vmul.f32 %v2430_v38, %v344_v41 }
 0x41a   :  { %v349_v39 = vpop.permute.xlu0 %348 }
 0x41b   :  { %v351_v40 = vmul.f32 %v2430_v38, %v349_v39 }
 0x41d   :  { %353 = vrot.lane.b32.xlu1 %v351_v40, %s2618_s3 }
 0x48f   :  { %v354_v43 = vpop.permute.xlu1 %353 }
 0x490   :  { %v356_v44 = vadd.f32 %v354_v43, %v346_v42 }
 0x492   :  { %2431 = vtanh.f32 %v356_v44  ;;  %v456_v61 = vrot.slane %v356_v44, 6 }
 0x49f   :  { %v2432_v45 = vpop.eup %2431 }
 0x4a0   :  { %359 = vrot.lane.b32.xlu0 %v2432_v45, %s2617_s10 }
 0x512   :  { %v360_v46 = vpop.permute.xlu0 %359 }
 0x513   :  { %v2763_v47 = vmul.f32 %v2430_v38, %v360_v46 }
 0x515   :  { %v369_v48 = vrot.slane %v2763_v47, 2 }
 0x517   :  { %370 = vrot.lane.b32.xlu1 %v369_v48, %s2618_s3 }
 0x589   :  { %v371_v49 = vpop.permute.xlu1 %370 }
 0x58a   :  { %2241 = vmatmul.mubr.msk.f32.vlgmr.msra.gmra.mxu1 %vm155_vm3, %v371_v49 }
 0x58b   :  { %2255 = vmatpush3.msra.mxu1 %v2682_v2  ;;  %2262 = vmatprep.mubr.msk.f32.mxu1 %vm2616_vm0, %v2615_v0 }
 0x58c   :  { %2256 = vmatprep.subr.mxu1 %v2615_v0 }
 0x58d   :  { %2257 = vmatpush3.msra.mxu1 %v2694_v5 }
 0x58e   :  { %2258 = vmatprep.subr.mxu1 %v2615_v0 }
 0x58f   :  { %2259 = vmatpush3.msra.mxu1 %v2700_v6 }
 0x590   :  { %2260 = vmatprep.subr.mxu1 %v2615_v0 }
 0x591   :  { %2261 = vmatpush3.msra.mxu1 %v2708_v7 }
 0x592   :  { %2276 = vmatprep.subr.mxu1 %v2615_v0 }
 0x64a   :  { %v440_v50 = vpop.f32.mrf.mxu1 }
 0x64b   :  { %v445_v51 = vrot.slane %v440_v50, 4 }
 0x64c   :  { %v2242_v52 = vpop.f32.mrf.mxu1 }
 0x64d   :  { %v447_v53 = vadd.f32 %v445_v51, %v2740_v12 }
 0x64f   :  { %2433 = vtanh.f32 %v447_v53  ;;  %v2080_v55 = vmul.f32 -1.442695, %v447_v53 }
 0x651   :  { %2435 = vpow2.f32 %v2080_v55 }
 0x65c   :  { %v2434_v54 = vpop.eup %2433 }
 0x65d   :  { %460 = vrot.lane.b32.xlu0 %v2434_v54, %s2617_s10 }
 0x65e   :  { %v2436_v56 = vpop.eup %2435 }
 0x65f   :  { %v451_v57 = vadd.f32 1.0, %v2436_v56 }
 0x661   :  { %2437 = vrcp.f32 %v451_v57 }
 0x66e   :  { %v2438_v58 = vpop.eup %2437 }
 0x66f   :  { %v458_v62 = vmul.f32 %v2438_v58, %v456_v61 }
 0x6cf   :  { %v461_v59 = vpop.permute.xlu0 %460 }
 0x6d0   :  { %v463_v60 = vmul.f32 %v2438_v58, %v461_v59 }
 0x6d2   :  { %465 = vrot.lane.b32.xlu1 %v463_v60, %s2618_s3 }
 0x744   :  { %v466_v63 = vpop.permute.xlu1 %465 }
 0x745   :  { %v468_v1 = vadd.f32 %v466_v63, %v458_v62 }
 0x747   :  { %2439 = vtanh.f32 %v468_v1  ;;  %v568_v24 = vrot.slane %v468_v1, 6 }
 0x754   :  { %v2440_v3 = vpop.eup %2439 }
 0x755   :  { %471 = vrot.lane.b32.xlu0 %v2440_v3, %s2617_s10 }
 0x7c7   :  { %v472_v4 = vpop.permute.xlu0 %471 }
 0x7c8   :  { %v2782_v8 = vmul.f32 %v2438_v58, %v472_v4 }
 0x7ca   :  { %v481_v9 = vrot.slane %v2782_v8, 4 }
 0x7cc   :  { %482 = vrot.lane.b32.xlu1 %v481_v9, %s2618_s3 }
 0x83e   :  { %v483_v11 = vpop.permute.xlu1 %482 }
 0x83f   :  { %2252 = vmatmul.mubr.msk.f32.vlgmr.msra.gmra.mxu0 %vm155_vm3, %v483_v11 }
 0x840   :  { %2266 = vmatpush3.msra.mxu0 %v2682_v2  ;;  %2273 = vmatprep.mubr.msk.f32.mxu0 %vm2616_vm0, %v2615_v0 }
 0x841   :  { %2267 = vmatprep.subr.mxu0 %v2615_v0 }
 0x842   :  { %2268 = vmatpush3.msra.mxu0 %v2694_v5 }
 0x843   :  { %2269 = vmatprep.subr.mxu0 %v2615_v0 }
 0x844   :  { %2270 = vmatpush3.msra.mxu0 %v2700_v6 }
 0x845   :  { %2271 = vmatprep.subr.mxu0 %v2615_v0 }
 0x846   :  { %2272 = vmatpush3.msra.mxu0 %v2708_v7 }
 0x847   :  { %2287 = vmatprep.subr.mxu0 %v2615_v0 }
 0x8ff   :  { %v552_v13 = vpop.f32.mrf.mxu0 }
 0x900   :  { %v557_v14 = vrot.slane %v552_v13, 2 }
 0x901   :  { %v2253_v15 = vpop.f32.mrf.mxu0 }
 0x902   :  { %v559_v16 = vadd.f32 %v557_v14, %v2740_v12 }
 0x904   :  { %2441 = vtanh.f32 %v559_v16  ;;  %v2082_v18 = vmul.f32 -1.442695, %v559_v16 }
 0x906   :  { %2443 = vpow2.f32 %v2082_v18 }
 0x911   :  { %v2442_v17 = vpop.eup %2441 }
 0x912   :  { %572 = vrot.lane.b32.xlu0 %v2442_v17, %s2617_s10 }
 0x913   :  { %v2444_v19 = vpop.eup %2443 }
 0x914   :  { %v563_v20 = vadd.f32 1.0, %v2444_v19 }
 0x916   :  { %2445 = vrcp.f32 %v563_v20 }
 0x923   :  { %v2446_v21 = vpop.eup %2445 }
 0x924   :  { %v570_v25 = vmul.f32 %v2446_v21, %v568_v24 }
 0x984   :  { %v573_v22 = vpop.permute.xlu0 %572 }
 0x985   :  { %v575_v23 = vmul.f32 %v2446_v21, %v573_v22 }
 0x987   :  { %577 = vrot.lane.b32.xlu1 %v575_v23, %s2618_s3 }
 0x9f9   :  { %v578_v26 = vpop.permute.xlu1 %577 }
 0x9fa   :  { %v580_v27 = vadd.f32 %v578_v26, %v570_v25 }
 0x9fc   :  { %2447 = vtanh.f32 %v580_v27  ;;  %v677_v42 = vrot.slane %v580_v27, 6 }
 0xa09   :  { %v2448_v12 = vpop.eup %2447 }
 0xa0a   :  { %583 = vrot.lane.b32.xlu0 %v2448_v12, %s2617_s10 }
 0xa7c   :  { %v584_v28 = vpop.permute.xlu0 %583 }
 0xa7d   :  { %v2801_v29 = vmul.f32 %v2446_v21, %v584_v28 }
 0xa7f   :  { %v593_v30 = vrot.slane %v2801_v29, 6 }
 0xa81   :  { %594 = vrot.lane.b32.xlu1 %v593_v30, %s2618_s3 }
 0xaf3   :  { %v595_v31 = vpop.permute.xlu1 %594 }
 0xaf4   :  { %2263 = vmatmul.mubr.msk.f32.vlgmr.msra.gmra.mxu1 %vm155_vm3, %v595_v31 }
 0xaf5   :  { %2277 = vmatpush3.msra.mxu1 %v2682_v2  ;;  %2284 = vmatprep.mubr.msk.f32.mxu1 %vm2616_vm0, %v2615_v0 }
 0xaf6   :  { %2278 = vmatprep.subr.mxu1 %v2615_v0 }
 0xaf7   :  { %2279 = vmatpush3.msra.mxu1 %v2694_v5 }
 0xaf8   :  { %2280 = vmatprep.subr.mxu1 %v2615_v0 }
 0xaf9   :  { %2281 = vmatpush3.msra.mxu1 %v2700_v6 }
 0xafa   :  { %2282 = vmatprep.subr.mxu1 %v2615_v0 }
 0xafb   :  { %2283 = vmatpush3.msra.mxu1 %v2708_v7 }
 0xbb4   :  { %v664_v32 = vpop.f32.mrf.mxu1 }
 0xbb5   :  { %v668_v33 = vadd.f32 %v664_v32, %v2738_v10 }
 0xbb6   :  { %v2264_v34 = vpop.f32.mrf.mxu1 }
 0xbb7   :  { %2449 = vtanh.f32 %v668_v33  ;;  %v2084_v36 = vmul.f32 -1.442695, %v668_v33 }
 0xbb9   :  { %2451 = vpow2.f32 %v2084_v36 }
 0xbc4   :  { %v2450_v35 = vpop.eup %2449 }
 0xbc5   :  { %681 = vrot.lane.b32.xlu0 %v2450_v35, %s2617_s10 }
 0xbc6   :  { %v2452_v37 = vpop.eup %2451 }
 0xbc7   :  { %v672_v38 = vadd.f32 1.0, %v2452_v37 }
 0xbc9   :  { %2453 = vrcp.f32 %v672_v38 }
 0xbd6   :  { %v2454_v39 = vpop.eup %2453 }
 0xbd7   :  { %v679_v43 = vmul.f32 %v2454_v39, %v677_v42 }
 0xc37   :  { %v682_v40 = vpop.permute.xlu0 %681 }
 0xc38   :  { %v684_v41 = vmul.f32 %v2454_v39, %v682_v40 }
 0xc3a   :  { %686 = vrot.lane.b32.xlu1 %v684_v41, %s2618_s3 }
 0xcac   :  { %v687_v44 = vpop.permute.xlu1 %686 }
 0xcad   :  { %v689_v45 = vadd.f32 %v687_v44, %v679_v43 }
 0xcaf   :  { %2455 = vtanh.f32 %v689_v45 }
 0xcbc   :  { %v2456_v46 = vpop.eup %2455 }
 0xcbd   :  { %692 = vrot.lane.b32.xlu0 %v2456_v46, %s2617_s10 }
 0xd2f   :  { %v693_v48 = vpop.permute.xlu0 %692 }
 0xd30   :  { %v695_v49 = vmul.f32 %v2454_v39, %v693_v48  ;;  %v1036_v48 = vld [vmem:[%s3052_s4 + $0x18] sm:$0xff] }
 0xd31   :  { %2298 = vmatprep.subr.mxu1 %v1036_v48 }
 0xd32   :  { %697 = vrot.lane.b32.xlu1 %v695_v49, %s2618_s3  ;;  %v1035_v49 = vld [vmem:[%s3052_s4 + $0x10] sm:$0xff] }
 0xda4   :  { %v698_v50 = vpop.permute.xlu1 %697 }
 0xda5   :  { %700 = vst.msk [vmem:[#allocation2 + $0x8] sm:$0x3] %vm258_vm2, %v698_v50  ;;  %2274 = vmatmul.mubr.msk.f32.vlgmr.msra.gmra.mxu0 %vm155_vm3, %v698_v50  ;;  %v2871_v50 = vld [vmem:[#allocation6 + $0x18] sm:$0xff] }
 0xda6   :  { %2288 = vmatpush3.msra.mxu0 %v2682_v2  ;;  %2295 = vmatprep.mubr.msk.f32.mxu0 %vm2616_vm0, %v2615_v0 }
 0xda7   :  { %2289 = vmatprep.subr.mxu0 %v2615_v0 }
 0xda8   :  { %2290 = vmatpush3.msra.mxu0 %v2694_v5 }
 0xda9   :  { %2291 = vmatprep.subr.mxu0 %v2615_v0 }
 0xdaa   :  { %2292 = vmatpush3.msra.mxu0 %v2700_v6 }
 0xdab   :  { %2293 = vmatprep.subr.mxu0 %v2615_v0 }
 0xdac   :  { %2294 = vmatpush3.msra.mxu0 %v2708_v7  ;;  %v785_v7 = vrot.slane %v689_v45, 6 }
 0xdad   :  { %2309 = vmatprep.subr.mxu0 %v2615_v0 }
 0xe65   :  { %v769_v51 = vpop.f32.mrf.mxu0 }
 0xe66   :  { %v774_v52 = vrot.slane %v769_v51, 6  ;;  %v2877_v51 = vld [vmem:[#allocation6 + $0x10] sm:$0xff] }
 0xe67   :  { %v2275_v2 = vpop.f32.mrf.mxu0 }
 0xe68   :  { %v776_v53 = vadd.f32 %v774_v52, %v2738_v10  ;;  %v2880_v52 = vld [vmem:[#allocation6 + $0x8] sm:$0xff] }
 0xe69   :  { %v1033_v2 = vld [vmem:[%s3052_s4] sm:$0xff] }
 0xe6a   :  { %2457 = vtanh.f32 %v776_v53  ;;  %v2086_v5 = vmul.f32 -1.442695, %v776_v53  ;;  %v2889_v53 = vld [vmem:[#allocation6] sm:$0xff] }
 0xe6c   :  { %2459 = vpow2.f32 %v2086_v5 }
 0xe77   :  { %v2458_v54 = vpop.eup %2457 }
 0xe78   :  { %789 = vrot.lane.b32.xlu0 %v2458_v54, %s2617_s10 }
 0xe79   :  { %v2460_v55 = vpop.eup %2459 }
 0xe7a   :  { %v780_v56 = vadd.f32 1.0, %v2460_v55 }
 0xe7c   :  { %2461 = vrcp.f32 %v780_v56 }
 0xe89   :  { %v2462_v6 = vpop.eup %2461 }
 0xe8a   :  { %v787_v59 = vmul.f32 %v2462_v6, %v785_v7 }
 0xeea   :  { %v790_v57 = vpop.permute.xlu0 %789 }
 0xeeb   :  { %v792_v58 = vmul.f32 %v2462_v6, %v790_v57 }
 0xeed   :  { %794 = vrot.lane.b32.xlu1 %v792_v58, %s2618_s3 }
 0xf5f   :  { %v795_v60 = vpop.permute.xlu1 %794 }
 0xf60   :  { %v797_v61 = vadd.f32 %v795_v60, %v787_v59  ;;  %v2091_v60 = vld [vmem:[%s3054_s6] ss:$0 sm:$0xff] }
 0xf62   :  { %2463 = vtanh.f32 %v797_v61  ;;  %v896_v22 = vrot.slane %v797_v61, 6 }
 0xf6f   :  { %v2464_v62 = vpop.eup %2463 }
 0xf70   :  { %800 = vrot.lane.b32.xlu0 %v2464_v62, %s2617_s10 }
 0xfe2   :  { %v801_v63 = vpop.permute.xlu0 %800 }
 0xfe3   :  { %v2836_v1 = vmul.f32 %v2462_v6, %v801_v63 }
 0xfe5   :  { %v809_v3 = vrot.slane %v2836_v1, 2 }
 0xfe7   :  { %810 = vrot.lane.b32.xlu1 %v809_v3, %s2618_s3 }
0x1059   :  { %v811_v4 = vpop.permute.xlu1 %810 }
0x105a   :  { %2285 = vmatmul.mubr.msk.f32.vlgmr.msra.gmra.mxu1 %vm155_vm3, %v811_v4 }
0x105b   :  { %2299 = vmatpush3.msra.mxu1 %v1036_v48 }
0x105c   :  { %2300 = vmatprep.subr.mxu1 %v1035_v49 }
0x105d   :  { %2301 = vmatpush3.msra.mxu1 %v1035_v49 }
0x111a   :  { %v880_v9 = vpop.f32.mrf.mxu1 }
0x111b   :  { %v885_v11 = vrot.slane %v880_v9, 4 }
0x111c   :  { %v2286_v13 = vpop.f32.mrf.mxu1 }
0x111d   :  { %v887_v14 = vadd.f32 %v885_v11, %v2738_v10 }
0x111f   :  { %2465 = vtanh.f32 %v887_v14  ;;  %v2088_v16 = vmul.f32 -1.442695, %v887_v14 }
0x1121   :  { %2467 = vpow2.f32 %v2088_v16 }
0x112c   :  { %v2466_v15 = vpop.eup %2465 }
0x112d   :  { %900 = vrot.lane.b32.xlu0 %v2466_v15, %s2617_s10 }
0x112e   :  { %v2468_v17 = vpop.eup %2467 }
0x112f   :  { %v891_v18 = vadd.f32 1.0, %v2468_v17 }
0x1131   :  { %2469 = vrcp.f32 %v891_v18 }
0x113e   :  { %v2470_v19 = vpop.eup %2469 }
0x113f   :  { %v898_v23 = vmul.f32 %v2470_v19, %v896_v22 }
0x119f   :  { %v901_v20 = vpop.permute.xlu0 %900 }
0x11a0   :  { %v903_v21 = vmul.f32 %v2470_v19, %v901_v20 }
0x11a2   :  { %905 = vrot.lane.b32.xlu1 %v903_v21, %s2618_s3 }
0x1214   :  { %v906_v24 = vpop.permute.xlu1 %905 }
0x1215   :  { %v908_v25 = vadd.f32 %v906_v24, %v898_v23 }
0x1217   :  { %2471 = vtanh.f32 %v908_v25 }
0x1224   :  { %v2472_v26 = vpop.eup %2471 }
0x1225   :  { %911 = vrot.lane.b32.xlu0 %v2472_v26, %s2617_s10 }
0x1297   :  { %v912_v27 = vpop.permute.xlu0 %911 }
0x1298   :  { %v914_v12 = vmul.f32 %v2470_v19, %v912_v27 }
0x129a   :  { %v920_v28 = vrot.slane %v914_v12, 4 }
0x129c   :  { %921 = vrot.lane.b32.xlu1 %v920_v28, %s2618_s3 }
0x130e   :  { %v922_v30 = vpop.permute.xlu1 %921 }
0x130f   :  { %2296 = vmatmul.mubr.msk.f32.vlgmr.msra.gmra.mxu0 %vm155_vm3, %v922_v30 }
0x1310   :  { %2317 = vmatprep.mubr.msk.f32.mxu0 %vm2616_vm0, %v2615_v0  ;;  %2310 = vmatpush3.msra.mxu0 %v2871_v50 }
0x1311   :  { %2311 = vmatprep.subr.mxu0 %v2615_v0 }
0x1312   :  { %2312 = vmatpush3.msra.mxu0 %v2877_v51 }
0x1313   :  { %2313 = vmatprep.subr.mxu0 %v2615_v0 }
0x1314   :  { %2314 = vmatpush3.msra.mxu0 %v2880_v52 }
0x1315   :  { %2315 = vmatprep.subr.mxu0 %v2615_v0 }
0x1316   :  { %2316 = vmatpush3.msra.mxu0 %v2889_v53 }
0x1317   :  { %2318 = vmatmul.mubr.f32.vlgmr.msra.gmra.mxu0 %v2615_v0  ;;  %2331 = vmatprep.subr.mxu0 %v2615_v0 }
0x1318   :  { %2332 = vmatpush3.msra.mxu0 %v2871_v50  ;;  %2339 = vmatprep.mubr.msk.f32.mxu0 %vm2616_vm0, %v2615_v0 }
0x1319   :  { %2333 = vmatprep.subr.mxu0 %v2615_v0 }
0x131a   :  { %2334 = vmatpush3.msra.mxu0 %v2877_v51 }
0x131b   :  { %2335 = vmatprep.subr.mxu0 %v2615_v0 }
0x131c   :  { %2336 = vmatpush3.msra.mxu0 %v2880_v52 }
0x131d   :  { %2337 = vmatprep.subr.mxu0 %v2615_v0 }
0x131e   :  { %2338 = vmatpush3.msra.mxu0 %v2889_v53 }
0x131f   :  { %2353 = vmatprep.subr.mxu0 %v2615_v0 }
0x13cf   :  { %v991_v31 = vpop.f32.mrf.mxu0 }
0x13d0   :  { %v996_v32 = vrot.slane %v991_v31, 2 }
0x13d1   :  { %v2297_v33 = vpop.f32.mrf.mxu0 }
0x13d2   :  { %v998_v34 = vadd.f32 %v996_v32, %v2738_v10  ;;  %v1007_v10 = vrot.slane %v908_v25, 6 }
0x13d4   :  { %2473 = vtanh.f32 %v998_v34  ;;  %v2090_v36 = vmul.f32 -1.442695, %v998_v34 }
0x13d6   :  { %2475 = vpow2.f32 %v2090_v36 }
0x13d7   :  { %v1195_v7 = vpop.f32.mrf.mxu0 }
0x13d9   :  { %v2319_v59 = vpop.f32.mrf.mxu0 }
0x13e1   :  { %v2474_v35 = vpop.eup %2473 }
0x13e2   :  { %1011 = vrot.lane.b32.xlu0 %v2474_v35, %s2617_s10 }
0x13e3   :  { %v2476_v37 = vpop.eup %2475 }
0x13e4   :  { %v1002_v38 = vadd.f32 1.0, %v2476_v37 }
0x13e6   :  { %2477 = vrcp.f32 %v1002_v38 }
0x13f3   :  { %v2478_v39 = vpop.eup %2477 }
0x13f4   :  { %v1009_v42 = vmul.f32 %v2478_v39, %v1007_v10 }
0x1454   :  { %v1012_v40 = vpop.permute.xlu0 %1011 }
0x1455   :  { %v1014_v41 = vmul.f32 %v2478_v39, %v1012_v40 }
0x1457   :  { %1016 = vrot.lane.b32.xlu1 %v1014_v41, %s2618_s3 }
0x145b   :  { %364 = vrot.lane.b32.xlu1 %v2763_v47, %s2618_s3 }
0x145f   :  { %588 = vrot.lane.b32.xlu1 %v2801_v29, %s2618_s3 }
0x1463   :  { %916 = vrot.lane.b32.xlu1 %v914_v12, %s2618_s3 }
0x14c9   :  { %v1017_v43 = vpop.permute.xlu1 %1016 }
0x14ca   :  { %v1019_v44 = vadd.f32 %v1017_v43, %v1009_v42 }
0x14cc   :  { %2479 = vtanh.f32 %v1019_v44 }
0x14cd   :  { %v365_v45 = vpop.permute.xlu1 %364 }
0x14ce   :  { %368 = vst.msk [vmem:[#allocation2] sm:$0xc] %vm367_vm4, %v365_v45 }
0x14d1   :  { %v589_v46 = vpop.permute.xlu1 %588 }
0x14d2   :  { %592 = vst.msk [vmem:[#allocation2] sm:$0xc0] %vm591_vm5, %v589_v46 }
0x14d5   :  { %v917_v47 = vpop.permute.xlu1 %916 }
0x14d6   :  { %919 = vst.msk [vmem:[#allocation2 + $0x8] sm:$0x30] %vm479_vm6, %v917_v47 }
0x14d9   :  { %v2480_v29 = vpop.eup %2479 }
0x14da   :  { %1022 = vrot.lane.b32.xlu0 %v2480_v29, %s2617_s10 }
0x14de   :  { %476 = vrot.lane.b32.xlu0 %v2782_v8, %s2618_s3  ;;  %v1034_v8 = vld [vmem:[%s3052_s4 + $0x8] sm:$0xff] }
0x14df   :  { %2302 = vmatprep.subr.mxu1 %v1034_v8 }
0x14e0   :  { %2303 = vmatpush3.msra.mxu1 %v1034_v8 }
0x14e1   :  { %2304 = vmatprep.subr.mxu1 %v1033_v2 }
0x14e2   :  { %805 = vrot.lane.b32.xlu0 %v2836_v1, %s2618_s3  ;;  %2305 = vmatpush3.msra.mxu1 %v1033_v2 }
0x14e3   :  { %2320 = vmatprep.subr.mxu1 %v2615_v0 }
0x154c   :  { %v1023_v54 = vpop.permute.xlu0 %1022 }
0x154d   :  { %v1025_v5 = vmul.f32 %v2478_v39, %v1023_v54 }
0x154f   :  { %1027 = vrot.lane.b32.xlu0 %v1025_v5, %s2618_s3 }
0x1550   :  { %v477_v55 = vpop.permute.xlu0 %476 }
0x1551   :  { %480 = vst.msk [vmem:[#allocation2] sm:$0x30] %vm479_vm6, %v477_v55 }
0x1554   :  { %v806_v56 = vpop.permute.xlu0 %805 }
0x1555   :  { %808 = vst.msk [vmem:[#allocation2 + $0x8] sm:$0xc] %vm367_vm4, %v806_v56 }
0x1558   :  { %v1031_v6 = vld [vmem:[#allocation2] sm:$0xff] }
0x1559   :  { %2306 = vmatprep.mubr.msk.f32.mxu1 %vm155_vm3, %v1031_v6 }
0x15c1   :  { %v1028_v57 = vpop.permute.xlu0 %1027 }
0x15c2   :  { %1030 = vst.msk [vmem:[#allocation2 + $0x8] sm:$0xc0] %vm591_vm5, %v1028_v57 }
0x15c9   :  { %v1032_v58 = vld [vmem:[#allocation2 + $0x8] sm:$0xff] }
0x15ca   :  { %2307 = vmatmul.mubr.msk.f32.vlgmr.msra.gmra.mxu1 %vm155_vm3, %v1032_v58 }
0x15cb   :  { %2321 = vmatpush3.msra.mxu1 %v2871_v50  ;;  %2328 = vmatprep.mubr.msk.f32.mxu1 %vm2616_vm0, %v2615_v0 }
0x15cc   :  { %2322 = vmatprep.subr.mxu1 %v2615_v0 }
0x15cd   :  { %2323 = vmatpush3.msra.mxu1 %v2877_v51 }
0x15ce   :  { %2324 = vmatprep.subr.mxu1 %v2615_v0 }
0x15cf   :  { %2325 = vmatpush3.msra.mxu1 %v2880_v52 }
0x15d0   :  { %2326 = vmatprep.subr.mxu1 %v2615_v0 }
0x15d1   :  { %2327 = vmatpush3.msra.mxu1 %v2889_v53 }
0x15d2   :  { %2342 = vmatprep.subr.mxu1 %v2615_v0 }
0x168a   :  { %v2308_v61 = vpop.f32.mrf.mxu1 }
0x168b   :  { %v2924_v62 = vadd.f32 %v2308_v61, %v2091_v60 }
0x168c   :  { %v1120_v63 = vpop.f32.mrf.mxu1 }
0x168d   :  { %v2926_v1 = vadd.f32 %v2091_v60, %v1120_v63 }
0x168f   :  { %v1199_v3 = vadd.f32 %v1195_v7, %v2926_v1 }
0x1691   :  { %2481 = vtanh.f32 %v1199_v3  ;;  %v2094_v9 = vmul.f32 -1.442695, %v1199_v3 }
0x1693   :  { %2483 = vpow2.f32 %v2094_v9 }
0x169e   :  { %v2482_v4 = vpop.eup %2481 }
0x169f   :  { %1209 = vrot.lane.b32.xlu1 %v2482_v4, %s2617_s10 }
0x16a0   :  { %v2484_v11 = vpop.eup %2483 }
0x16a1   :  { %v1203_v13 = vadd.f32 1.0, %v2484_v11 }
0x16a3   :  { %2485 = vrcp.f32 %v1203_v13 }
0x16b0   :  { %v2486_v14 = vpop.eup %2485 }
0x16b1   :  { %v1207_v17 = vmul.f32 0.0, %v2486_v14 }
0x1711   :  { %v1210_v15 = vpop.permute.xlu1 %1209 }
0x1712   :  { %v1212_v16 = vmul.f32 %v2486_v14, %v1210_v15 }
0x1714   :  { %1214 = vrot.lane.b32.xlu0 %v1212_v16, %s2618_s3 }
0x1786   :  { %v1215_v18 = vpop.permute.xlu0 %1214 }
0x1787   :  { %v1217_v19 = vadd.f32 %v1215_v18, %v1207_v17 }
0x1789   :  { %2487 = vtanh.f32 %v1217_v19  ;;  %v1311_v35 = vrot.slane %v1217_v19, 6 }
0x1796   :  { %v2488_v20 = vpop.eup %2487 }
0x1797   :  { %1220 = vrot.lane.b32.xlu1 %v2488_v20, %s2617_s10 }
0x1809   :  { %v1221_v21 = vpop.permute.xlu1 %1220 }
0x180a   :  { %v1223_v22 = vmul.f32 %v2486_v14, %v1221_v21 }
0x180c   :  { %1225 = vrot.lane.b32.xlu0 %v1223_v22, %s2618_s3 }
0x187e   :  { %v1226_v23 = vpop.permute.xlu0 %1225 }
0x187f   :  { %2329 = vmatmul.mubr.msk.f32.vlgmr.msra.gmra.mxu1 %vm155_vm3, %v1226_v23 }
0x1880   :  { %2343 = vmatpush3.msra.mxu1 %v2871_v50  ;;  %2350 = vmatprep.mubr.msk.f32.mxu1 %vm2616_vm0, %v2615_v0 }
0x1881   :  { %2344 = vmatprep.subr.mxu1 %v2615_v0 }
0x1882   :  { %2345 = vmatpush3.msra.mxu1 %v2877_v51 }
0x1883   :  { %2346 = vmatprep.subr.mxu1 %v2615_v0 }
0x1884   :  { %2347 = vmatpush3.msra.mxu1 %v2880_v52 }
0x1885   :  { %2348 = vmatprep.subr.mxu1 %v2615_v0 }
0x1886   :  { %2349 = vmatpush3.msra.mxu1 %v2889_v53 }
0x1887   :  { %2364 = vmatprep.subr.mxu1 %v2615_v0 }
0x193f   :  { %v1295_v24 = vpop.f32.mrf.mxu1 }
0x1940   :  { %v1300_v25 = vrot.slane %v1295_v24, 6 }
0x1941   :  { %v2330_v26 = vpop.f32.mrf.mxu1 }
0x1942   :  { %v1302_v27 = vadd.f32 %v1300_v25, %v2926_v1 }
0x1944   :  { %2489 = vtanh.f32 %v1302_v27  ;;  %v2096_v28 = vmul.f32 -1.442695, %v1302_v27 }
0x1946   :  { %2491 = vpow2.f32 %v2096_v28 }
0x1951   :  { %v2490_v12 = vpop.eup %2489 }
0x1952   :  { %1315 = vrot.lane.b32.xlu1 %v2490_v12, %s2617_s10 }
0x1953   :  { %v2492_v30 = vpop.eup %2491 }
0x1954   :  { %v1306_v31 = vadd.f32 1.0, %v2492_v30 }
0x1956   :  { %2493 = vrcp.f32 %v1306_v31 }
0x1963   :  { %v2494_v32 = vpop.eup %2493 }
0x1964   :  { %v1313_v36 = vmul.f32 %v2494_v32, %v1311_v35 }
0x19c4   :  { %v1316_v33 = vpop.permute.xlu1 %1315 }
0x19c5   :  { %v1318_v34 = vmul.f32 %v2494_v32, %v1316_v33 }
0x19c7   :  { %1320 = vrot.lane.b32.xlu0 %v1318_v34, %s2618_s3 }
0x1a39   :  { %v1321_v37 = vpop.permute.xlu0 %1320 }
0x1a3a   :  { %v1323_v38 = vadd.f32 %v1321_v37, %v1313_v36 }
0x1a3c   :  { %2495 = vtanh.f32 %v1323_v38  ;;  %v1418_v5 = vrot.slane %v1323_v38, 6 }
0x1a49   :  { %v2496_v39 = vpop.eup %2495 }
0x1a4a   :  { %1326 = vrot.lane.b32.xlu1 %v2496_v39, %s2617_s10 }
0x1abc   :  { %v1327_v40 = vpop.permute.xlu1 %1326 }
0x1abd   :  { %v1329_v41 = vmul.f32 %v2494_v32, %v1327_v40 }
0x1abf   :  { %v1331_v10 = vrot.slane %v1329_v41, 2 }
0x1ac1   :  { %1332 = vrot.lane.b32.xlu0 %v1331_v10, %s2618_s3 }
0x1b33   :  { %v1333_v42 = vpop.permute.xlu0 %1332 }
0x1b34   :  { %2340 = vmatmul.mubr.msk.f32.vlgmr.msra.gmra.mxu0 %vm155_vm3, %v1333_v42 }
0x1b35   :  { %2354 = vmatpush3.msra.mxu0 %v2871_v50  ;;  %2361 = vmatprep.mubr.msk.f32.mxu0 %vm2616_vm0, %v2615_v0 }
0x1b36   :  { %2355 = vmatprep.subr.mxu0 %v2615_v0 }
0x1b37   :  { %2356 = vmatpush3.msra.mxu0 %v2877_v51 }
0x1b38   :  { %2357 = vmatprep.subr.mxu0 %v2615_v0 }
0x1b39   :  { %2358 = vmatpush3.msra.mxu0 %v2880_v52 }
0x1b3a   :  { %2359 = vmatprep.subr.mxu0 %v2615_v0 }
0x1b3b   :  { %2360 = vmatpush3.msra.mxu0 %v2889_v53 }
0x1b3c   :  { %2375 = vmatprep.subr.mxu0 %v2615_v0 }
0x1bf4   :  { %v1402_v43 = vpop.f32.mrf.mxu0 }
0x1bf5   :  { %v1407_v44 = vrot.slane %v1402_v43, 4 }
0x1bf6   :  { %v2341_v45 = vpop.f32.mrf.mxu0 }
0x1bf7   :  { %v1409_v46 = vadd.f32 %v1407_v44, %v2926_v1 }
0x1bf9   :  { %2497 = vtanh.f32 %v1409_v46  ;;  %v2098_v29 = vmul.f32 -1.442695, %v1409_v46 }
0x1bfb   :  { %2499 = vpow2.f32 %v2098_v29 }
0x1c06   :  { %v2498_v47 = vpop.eup %2497 }
0x1c07   :  { %1422 = vrot.lane.b32.xlu1 %v2498_v47, %s2617_s10 }
0x1c08   :  { %v2500_v48 = vpop.eup %2499 }
0x1c09   :  { %v1413_v49 = vadd.f32 1.0, %v2500_v48 }
0x1c0b   :  { %2501 = vrcp.f32 %v1413_v49 }
0x1c18   :  { %v2502_v8 = vpop.eup %2501 }
0x1c19   :  { %v1420_v55 = vmul.f32 %v2502_v8, %v1418_v5 }
0x1c79   :  { %v1423_v2 = vpop.permute.xlu1 %1422 }
0x1c7a   :  { %v1425_v54 = vmul.f32 %v2502_v8, %v1423_v2 }
0x1c7c   :  { %1427 = vrot.lane.b32.xlu0 %v1425_v54, %s2618_s3 }
0x1cee   :  { %v1428_v56 = vpop.permute.xlu0 %1427 }
0x1cef   :  { %v1430_v6 = vadd.f32 %v1428_v56, %v1420_v55 }
0x1cf1   :  { %2503 = vtanh.f32 %v1430_v6  ;;  %v1525_v18 = vrot.slane %v1430_v6, 6 }
0x1cfe   :  { %v2504_v57 = vpop.eup %2503 }
0x1cff   :  { %1433 = vrot.lane.b32.xlu1 %v2504_v57, %s2617_s10 }
0x1d71   :  { %v1434_v58 = vpop.permute.xlu1 %1433 }
0x1d72   :  { %v1436_v7 = vmul.f32 %v2502_v8, %v1434_v58 }
0x1d74   :  { %v1438_v59 = vrot.slane %v1436_v7, 4 }
0x1d76   :  { %1439 = vrot.lane.b32.xlu0 %v1438_v59, %s2618_s3 }
0x1de8   :  { %v1440_v60 = vpop.permute.xlu0 %1439 }
0x1de9   :  { %2351 = vmatmul.mubr.msk.f32.vlgmr.msra.gmra.mxu1 %vm155_vm3, %v1440_v60 }
0x1dea   :  { %2365 = vmatpush3.msra.mxu1 %v2871_v50  ;;  %2372 = vmatprep.mubr.msk.f32.mxu1 %vm2616_vm0, %v2615_v0 }
0x1deb   :  { %2366 = vmatprep.subr.mxu1 %v2615_v0 }
0x1dec   :  { %2367 = vmatpush3.msra.mxu1 %v2877_v51 }
0x1ded   :  { %2368 = vmatprep.subr.mxu1 %v2615_v0 }
0x1dee   :  { %2369 = vmatpush3.msra.mxu1 %v2880_v52 }
0x1def   :  { %2370 = vmatprep.subr.mxu1 %v2615_v0 }
0x1df0   :  { %2371 = vmatpush3.msra.mxu1 %v2889_v53 }
0x1df1   :  { %2386 = vmatprep.subr.mxu1 %v2615_v0 }
0x1ea9   :  { %v1509_v61 = vpop.f32.mrf.mxu1 }
0x1eaa   :  { %v1514_v63 = vrot.slane %v1509_v61, 2 }
0x1eab   :  { %v2352_v3 = vpop.f32.mrf.mxu1 }
0x1eac   :  { %v1516_v4 = vadd.f32 %v1514_v63, %v2926_v1 }
0x1eae   :  { %2505 = vtanh.f32 %v1516_v4  ;;  %v2100_v11 = vmul.f32 -1.442695, %v1516_v4 }
0x1eb0   :  { %2507 = vpow2.f32 %v2100_v11 }
0x1ebb   :  { %v2506_v9 = vpop.eup %2505 }
0x1ebc   :  { %1529 = vrot.lane.b32.xlu1 %v2506_v9, %s2617_s10 }
0x1ebd   :  { %v2508_v13 = vpop.eup %2507 }
0x1ebe   :  { %v1520_v14 = vadd.f32 1.0, %v2508_v13 }
0x1ec0   :  { %2509 = vrcp.f32 %v1520_v14 }
0x1ecd   :  { %v2510_v15 = vpop.eup %2509 }
0x1ece   :  { %v1527_v19 = vmul.f32 %v2510_v15, %v1525_v18 }
0x1f2e   :  { %v1530_v16 = vpop.permute.xlu1 %1529 }
0x1f2f   :  { %v1532_v17 = vmul.f32 %v2510_v15, %v1530_v16 }
0x1f31   :  { %1534 = vrot.lane.b32.xlu0 %v1532_v17, %s2618_s3 }
0x1fa3   :  { %v1535_v20 = vpop.permute.xlu0 %1534 }
0x1fa4   :  { %v1537_v21 = vadd.f32 %v1535_v20, %v1527_v19 }
0x1fa6   :  { %2511 = vtanh.f32 %v1537_v21  ;;  %v1629_v36 = vrot.slane %v1537_v21, 6 }
0x1fb3   :  { %v2512_v1 = vpop.eup %2511 }
0x1fb4   :  { %1540 = vrot.lane.b32.xlu1 %v2512_v1, %s2617_s10 }
0x2026   :  { %v1541_v22 = vpop.permute.xlu1 %1540 }
0x2027   :  { %v1543_v23 = vmul.f32 %v2510_v15, %v1541_v22 }
0x2029   :  { %v1545_v24 = vrot.slane %v1543_v23, 6 }
0x202b   :  { %1546 = vrot.lane.b32.xlu0 %v1545_v24, %s2618_s3 }
0x209d   :  { %v1547_v25 = vpop.permute.xlu0 %1546 }
0x209e   :  { %2362 = vmatmul.mubr.msk.f32.vlgmr.msra.gmra.mxu0 %vm155_vm3, %v1547_v25 }
0x209f   :  { %2376 = vmatpush3.msra.mxu0 %v2871_v50  ;;  %2383 = vmatprep.mubr.msk.f32.mxu0 %vm2616_vm0, %v2615_v0 }
0x20a0   :  { %2377 = vmatprep.subr.mxu0 %v2615_v0 }
0x20a1   :  { %2378 = vmatpush3.msra.mxu0 %v2877_v51 }
0x20a2   :  { %2379 = vmatprep.subr.mxu0 %v2615_v0 }
0x20a3   :  { %2380 = vmatpush3.msra.mxu0 %v2880_v52 }
0x20a4   :  { %2381 = vmatprep.subr.mxu0 %v2615_v0 }
0x20a5   :  { %2382 = vmatpush3.msra.mxu0 %v2889_v53 }
0x20a6   :  { %2397 = vmatprep.subr.mxu0 %v2615_v0 }
0x215e   :  { %v1616_v26 = vpop.f32.mrf.mxu0 }
0x215f   :  { %v1620_v27 = vadd.f32 %v1616_v26, %v2924_v62 }
0x2160   :  { %v2363_v12 = vpop.f32.mrf.mxu0 }
0x2161   :  { %2513 = vtanh.f32 %v1620_v27  ;;  %v2102_v30 = vmul.f32 -1.442695, %v1620_v27 }
0x2163   :  { %2515 = vpow2.f32 %v2102_v30 }
0x216e   :  { %v2514_v28 = vpop.eup %2513 }
0x216f   :  { %1633 = vrot.lane.b32.xlu1 %v2514_v28, %s2617_s10 }
0x2170   :  { %v2516_v31 = vpop.eup %2515 }
0x2171   :  { %v1624_v32 = vadd.f32 1.0, %v2516_v31 }
0x2173   :  { %2517 = vrcp.f32 %v1624_v32 }
0x2180   :  { %v2518_v33 = vpop.eup %2517 }
0x2181   :  { %v1631_v37 = vmul.f32 %v2518_v33, %v1629_v36 }
0x21e1   :  { %v1634_v34 = vpop.permute.xlu1 %1633 }
0x21e2   :  { %v1636_v35 = vmul.f32 %v2518_v33, %v1634_v34 }
0x21e4   :  { %1638 = vrot.lane.b32.xlu0 %v1636_v35, %s2618_s3 }
0x2256   :  { %v1639_v38 = vpop.permute.xlu0 %1638 }
0x2257   :  { %v1641_v39 = vadd.f32 %v1639_v38, %v1631_v37  ;;  %v1970_v37 = vld [vmem:[%s3055_s7 + $0x10] sm:$0xff]  ;;  %v1969_v38 = vld [vmem:[%s3055_s7 + $0x8] sm:$0xff] }
0x2259   :  { %2519 = vtanh.f32 %v1641_v39 }
0x2266   :  { %v2520_v40 = vpop.eup %2519 }
0x2267   :  { %1644 = vrot.lane.b32.xlu1 %v2520_v40, %s2617_s10 }
0x22d9   :  { %v1645_v41 = vpop.permute.xlu1 %1644 }
0x22da   :  { %v1647_v10 = vmul.f32 %v2518_v33, %v1645_v41 }
0x22dc   :  { %1649 = vrot.lane.b32.xlu0 %v1647_v10, %s2618_s3 }
0x234e   :  { %v1650_v42 = vpop.permute.xlu0 %1649 }
0x234f   :  { %2373 = vmatmul.mubr.msk.f32.vlgmr.msra.gmra.mxu1 %vm155_vm3, %v1650_v42 }
0x2350   :  { %2387 = vmatpush3.msra.mxu1 %v2871_v50  ;;  %2394 = vmatprep.mubr.msk.f32.mxu1 %vm2616_vm0, %v2615_v0 }
0x2351   :  { %2388 = vmatprep.subr.mxu1 %v2615_v0 }
0x2352   :  { %2389 = vmatpush3.msra.mxu1 %v2877_v51 }
0x2353   :  { %2390 = vmatprep.subr.mxu1 %v2615_v0 }
0x2354   :  { %2391 = vmatpush3.msra.mxu1 %v2880_v52 }
0x2355   :  { %2392 = vmatprep.subr.mxu1 %v2615_v0 }
0x2356   :  { %2393 = vmatpush3.msra.mxu1 %v2889_v53  ;;  %v1735_v53 = vrot.slane %v1641_v39, 6  ;;  %v1968_v39 = vld [vmem:[%s3055_s7] sm:$0xff] }
0x240f   :  { %v1719_v43 = vpop.f32.mrf.mxu1 }
0x2410   :  { %v1724_v44 = vrot.slane %v1719_v43, 6 }
0x2411   :  { %v2374_v45 = vpop.f32.mrf.mxu1 }
0x2412   :  { %v1726_v50 = vadd.f32 %v1724_v44, %v2924_v62  ;;  %v2109_v44 = vld [vmem:[%s3056_s8] ss:$0 sm:$0xff] }
0x2414   :  { %2521 = vtanh.f32 %v1726_v50  ;;  %v2104_v47 = vmul.f32 -1.442695, %v1726_v50 }
0x2416   :  { %2523 = vpow2.f32 %v2104_v47 }
0x2421   :  { %v2522_v46 = vpop.eup %2521 }
0x2422   :  { %1739 = vrot.lane.b32.xlu1 %v2522_v46, %s2617_s10 }
0x2423   :  { %v2524_v51 = vpop.eup %2523 }
0x2424   :  { %v1730_v29 = vadd.f32 1.0, %v2524_v51 }
0x2426   :  { %2525 = vrcp.f32 %v1730_v29 }
0x2433   :  { %v2526_v48 = vpop.eup %2525 }
0x2434   :  { %v1737_v8 = vmul.f32 %v2526_v48, %v1735_v53 }
0x2494   :  { %v1740_v52 = vpop.permute.xlu1 %1739 }
0x2495   :  { %v1742_v49 = vmul.f32 %v2526_v48, %v1740_v52 }
0x2497   :  { %1744 = vrot.lane.b32.xlu0 %v1742_v49, %s2618_s3 }
0x2509   :  { %v1745_v2 = vpop.permute.xlu0 %1744 }
0x250a   :  { %v1747_v54 = vadd.f32 %v1745_v2, %v1737_v8 }
0x250c   :  { %2527 = vtanh.f32 %v1747_v54  ;;  %v1842_v14 = vrot.slane %v1747_v54, 6 }
0x2519   :  { %v2528_v5 = vpop.eup %2527 }
0x251a   :  { %1750 = vrot.lane.b32.xlu1 %v2528_v5, %s2617_s10 }
0x258c   :  { %v1751_v55 = vpop.permute.xlu1 %1750 }
0x258d   :  { %v1753_v56 = vmul.f32 %v2526_v48, %v1751_v55 }
0x258f   :  { %v1755_v6 = vrot.slane %v1753_v56, 2 }
0x2591   :  { %1756 = vrot.lane.b32.xlu0 %v1755_v6, %s2618_s3 }
0x2603   :  { %v1757_v57 = vpop.permute.xlu0 %1756 }
0x2604   :  { %2384 = vmatmul.mubr.msk.f32.vlgmr.msra.gmra.mxu0 %vm155_vm3, %v1757_v57 }
0x2605   :  { %2405 = vmatprep.mubr.msk.f32.mxu0 %vm2616_vm0, %v2615_v0 }
0x26c4   :  { %v1826_v58 = vpop.f32.mrf.mxu0 }
0x26c5   :  { %v1831_v7 = vrot.slane %v1826_v58, 4 }
0x26c6   :  { %v2385_v59 = vpop.f32.mrf.mxu0 }
0x26c7   :  { %v1833_v60 = vadd.f32 %v1831_v7, %v2924_v62 }
0x26c9   :  { %2529 = vtanh.f32 %v1833_v60  ;;  %v2106_v63 = vmul.f32 -1.442695, %v1833_v60 }
0x26cb   :  { %2531 = vpow2.f32 %v2106_v63 }
0x26d6   :  { %v2530_v61 = vpop.eup %2529 }
0x26d7   :  { %1846 = vrot.lane.b32.xlu1 %v2530_v61, %s2617_s10 }
0x26d8   :  { %v2532_v3 = vpop.eup %2531 }
0x26d9   :  { %v1837_v4 = vadd.f32 1.0, %v2532_v3 }
0x26db   :  { %2533 = vrcp.f32 %v1837_v4 }
0x26e8   :  { %v2534_v9 = vpop.eup %2533 }
0x26e9   :  { %v1844_v15 = vmul.f32 %v2534_v9, %v1842_v14 }
0x2749   :  { %v1847_v11 = vpop.permute.xlu1 %1846 }
0x274a   :  { %v1849_v13 = vmul.f32 %v2534_v9, %v1847_v11 }
0x274c   :  { %1851 = vrot.lane.b32.xlu0 %v1849_v13, %s2618_s3 }
0x27be   :  { %v1852_v16 = vpop.permute.xlu0 %1851 }
0x27bf   :  { %v1854_v17 = vadd.f32 %v1852_v16, %v1844_v15 }
0x27c1   :  { %2535 = vtanh.f32 %v1854_v17  ;;  %v1949_v33 = vrot.slane %v1854_v17, 6 }
0x27ce   :  { %v2536_v18 = vpop.eup %2535 }
0x27cf   :  { %1857 = vrot.lane.b32.xlu1 %v2536_v18, %s2617_s10 }
0x2841   :  { %v1858_v19 = vpop.permute.xlu1 %1857 }
0x2842   :  { %v1860_v20 = vmul.f32 %v2534_v9, %v1858_v19 }
0x2844   :  { %v1862_v21 = vrot.slane %v1860_v20, 4 }
0x2846   :  { %1863 = vrot.lane.b32.xlu0 %v1862_v21, %s2618_s3 }
0x28b8   :  { %v1864_v1 = vpop.permute.xlu0 %1863 }
0x28b9   :  { %2395 = vmatmul.mubr.msk.f32.vlgmr.msra.gmra.mxu1 %vm155_vm3, %v1864_v1 }
0x2979   :  { %v1933_v22 = vpop.f32.mrf.mxu1 }
0x297a   :  { %v1938_v23 = vrot.slane %v1933_v22, 2 }
0x297b   :  { %v2396_v24 = vpop.f32.mrf.mxu1 }
0x297c   :  { %v1940_v25 = vadd.f32 %v1938_v23, %v2924_v62  ;;  %v1971_v62 = vld [vmem:[%s3055_s7 + $0x18] sm:$0xff]  ;;  %s2619_s7 = smov [#allocation8]  }
0x297d   :  { %2398 = vmatpush3.msra.mxu0 %v1971_v62  ;;  %s2063_s27 = sshll.u32 %s2619_s7, 4  ;;  %s2064_s27 = int_to_ptr.vmem [resolvable:$true] %s2063_s27 }
0x297e   :  { %2537 = vtanh.f32 %v1940_v25  ;;  %v2108_v27 = vmul.f32 -1.442695, %v1940_v25  ;;  %2399 = vmatprep.subr.mxu0 %v2615_v0  ;;  %s2585_s28 = scalar_lea.vmem %s2064_s27, 32  ;;  %p2590_p11 = scmp.lt.s32.totalorder %s2064_s27, %s2064_s27 }
0x297f   :  { %2400 = vmatpush3.msra.mxu0 %v1970_v37  ;;  %p2586_p10 = scmp.ne.s32.totalorder %s2064_s27, %s2585_s28  ;;  %p2591_p12 = scmp.lt.s32.totalorder %s2585_s28, %s2585_s28 }
0x2980   :  { %2539 = vpow2.f32 %v2108_v27  ;;  %2401 = vmatprep.subr.mxu0 %v2615_v0 }
0x2981   :  { %2402 = vmatpush3.msra.mxu0 %v1969_v38  ;;  %p2592_p13 = por %p2591_p12, %p2590_p11 }
0x2982   :  { %2403 = vmatprep.subr.mxu0 %v2615_v0 }
0x2983   :  { %2404 = vmatpush3.msra.mxu0 %v1968_v39  ;;  %p2593_p0 = pnand %p2592_p13, %p2586_p10 }
0x298b   :  { %v2538_v26 = vpop.eup %2537 }
0x298c   :  { %1953 = vrot.lane.b32.xlu1 %v2538_v26, %s2617_s10 }
0x298d   :  { %v2540_v12 = vpop.eup %2539 }
0x298e   :  { %v1944_v28 = vadd.f32 1.0, %v2540_v12 }
0x2990   :  { %2541 = vrcp.f32 %v1944_v28 }
0x299d   :  { %v2542_v30 = vpop.eup %2541 }
0x299e   :  { %v1951_v34 = vmul.f32 %v2542_v30, %v1949_v33 }
0x29fe   :  { %v1954_v31 = vpop.permute.xlu1 %1953 }
0x29ff   :  { %v1956_v32 = vmul.f32 %v2542_v30, %v1954_v31 }
0x2a01   :  { %1958 = vrot.lane.b32.xlu0 %v1956_v32, %s2618_s3 }
0x2a73   :  { %v1959_v35 = vpop.permute.xlu0 %1958 }
0x2a74   :  { %v1961_v36 = vadd.f32 %v1959_v35, %v1951_v34 }
0x2a76   :  { %2543 = vtanh.f32 %v1961_v36 }
0x2a83   :  { %v2544_v40 = vpop.eup %2543 }
0x2a84   :  { %1964 = vrot.lane.b32.xlu1 %v2544_v40, %s2617_s10 }
0x2af6   :  { %v1965_v41 = vpop.permute.xlu1 %1964 }
0x2af7   :  { %v1967_v10 = vmul.f32 %v2542_v30, %v1965_v41 }
0x2af9   :  { %v1980_v42 = vrot.slane %v1967_v10, 6 }
0x2afb   :  { %1981 = vrot.lane.b32.xlu0 %v1980_v42, %s2618_s3 }
0x2b6d   :  { %v1982_v43 = vpop.permute.xlu0 %1981 }
0x2b6e   :  { %2406 = vmatmul.mubr.msk.f32.vlgmr.msra.gmra.mxu0 %vm155_vm3, %v1982_v43 }
0x2c2e   :  { %v2051_v45 = vpop.f32.mrf.mxu0 }
0x2c2f   :  { %v2052_v0 = vadd.f32 %v2109_v44, %v2051_v45 }
0x2c30   :  { %v2407_v50 = vpop.f32.mrf.mxu0 }
0x2c31   :  { %2056 = vst.msk [vmem:[#allocation8] sm:$0x3] %vm2055_vm7, %v2052_v0 }
0x2c32   :  { %2596 = shalt.err (!%p2593_p0)
}
0x2c33   :  { %2066 = dma.vmem_to_hbm [thread:$0]  %s2064_s27, 32, %s3057_s9, [#allocation5]  }
0x2c34   :  { %2609 = dma.done.wait [#allocation5], 32  }
0x2c35   :  { %2610 = vsyncadd [#allocation5], 4294967264 }
0x2c36   :  { %2070 = vsyncpa [#allocation4], 1 }
0x2c37   :  { %2071 = vsyncpa [#allocation7], 1 }
0x2c38   :  { %2072 = vsyncpa [#allocation5], 1 }

</bundles_post_ra>
